<compile_context>
chip_gen: v7x
topology: tpu7x:2x2x1
jax: 0.10.0
libtpu: 0.0.40
codegen_flags: <defaults>
</compile_context>

<pallas_src>
from functools import partial

import numpy as np
import jax
import jax.numpy as jnp
from jax.experimental import pallas as pl
from jax.experimental.pallas import tpu as pltpu

_VMEM_LIMIT = 48 * 1024 * 1024  # headroom under v7x's 64 MiB VMEM; also fine on v5e/v6e


def _round_up(a, b):
    return (a + b - 1) // b * b


# ------------------------------ Pallas kernels --------------------------------
def conv_relu_stats_kernel(xs_ref, w_ref, b_ref, y_ref, stats_ref, *, m_total):
    """Pass 1: y = relu(xs @ w + b); per-tile (sum, sum_sq) partials for BatchNorm.

    xs_ref:    (TM, K)    bf16  im2col rows (K = 9*Cin)
    w_ref:     (K, TC)    bf16  folded 3x3 weights (channel tile, zero-padded)
    b_ref:     (1, TC)    f32   conv bias (zero-padded)
    y_ref:     (TM, TC)   bf16  conv + bias + relu
    stats_ref: (1, 2, TC) f32   row 0 = sum, row 1 = sum of squares (valid rows only)
    """
    tm = xs_ref.shape[0]

    # Single K = 9*Cin MXU matmul with f32 accumulation.
    acc = jnp.dot(xs_ref[...], w_ref[...], preferred_element_type=jnp.float32)
    acc = jnp.maximum(acc + b_ref[...], 0.0)
    y_ref[...] = acc.astype(y_ref.dtype)

    # Mask rows past the real M (M is zero-padded up to a multiple of the tile size);
    # relu(bias) on padded rows must not leak into the BatchNorm statistics.
    row0 = pl.program_id(0) * tm
    rows = row0 + jax.lax.broadcasted_iota(jnp.int32, (tm, 1), 0)
    valid = (rows < m_total).astype(jnp.float32)
    am = acc * valid
    s = jnp.sum(am, axis=0, keepdims=True)
    ss = jnp.sum(am * am, axis=0, keepdims=True)
    stats_ref[...] = jnp.concatenate([s, ss], axis=0)[None]


def bn_scale_shift_kernel(y_ref, scale_ref, shift_ref, o_ref):
    """Pass 2: o = y * scale + shift (per-channel affine from the global BN stats)."""
    y = y_ref[...].astype(jnp.float32)
    o_ref[...] = (y * scale_ref[...] + shift_ref[...]).astype(o_ref.dtype)


# ------------------------------ stage wrapper ---------------------------------
def _conv_relu_bn_stage(x_nhwc, w_hwio, bias, gamma, beta, pad, batch_norm,
                        *, block_m=512, out_dtype=jnp.float32):
    """One Conv2d(3x3) + ReLU (+ training-mode BatchNorm2d) stage. NHWC in/out."""
    xp = jnp.pad(x_nhwc, ((0, 0), (pad, pad), (pad, pad), (0, 0)))
    N, Hp, Wp, Cin = xp.shape
    H, W = Hp - 2, Wp - 2
    Cout = w_hwio.shape[-1]

    # Glue: true im2col -> single (M, 9*Cin) buffer, bf16 MXU operands.
    patches = [xp[:, dy:dy + H, dx:dx + W, :] for dy in range(3) for dx in range(3)]
    xs = jnp.concatenate(patches, axis=-1).reshape(N * H * W, 9 * Cin).astype(jnp.bfloat16)
    M = N * H * W
    K = 9 * Cin

    # Row tiling: cap the tile so the (bm, K) bf16 slab stays ~<=4 MiB even for large Cin.
    max_bm = max(64, ((4 << 20) // (2 * K)) // 8 * 8)
    bm = _round_up(min(block_m, max_bm, _round_up(M, 8)), 8)
    m_pad = _round_up(M, bm)
    if m_pad > M:
        xs = jnp.pad(xs, ((0, m_pad - M), (0, 0)))
    grid_m = m_pad // bm

    # Lane-dense channel dim: pad Cout (and params) to a multiple of 128; tile if very wide.
    cpad = _round_up(max(Cout, 128), 128)
    bc = cpad if cpad <= 512 else (256 if cpad % 256 == 0 else 128)
    grid_c = cpad // bc

    w = jnp.pad(w_hwio.reshape(K, Cout), ((0, 0), (0, cpad - Cout))).astype(jnp.bfloat16)
    b_p = jnp.pad(bias.astype(jnp.float32), (0, cpad - Cout)).reshape(1, cpad)
    g_p = jnp.pad(gamma.astype(jnp.float32), (0, cpad - Cout))
    be_p = jnp.pad(beta.astype(jnp.float32), (0, cpad - Cout))

    cparams = pltpu.CompilerParams(dimension_semantics=("parallel", "parallel"),
                                   vmem_limit_bytes=_VMEM_LIMIT)

    y, stats = pl.pallas_call(
        partial(conv_relu_stats_kernel, m_total=M),
        grid=(grid_m, grid_c),
        in_specs=[pl.BlockSpec((bm, K), lambda i, j: (i, 0)),
                  pl.BlockSpec((K, bc), lambda i, j: (0, j)),
                  pl.BlockSpec((1, bc), lambda i, j: (0, j))],
        out_specs=(pl.BlockSpec((bm, bc), lambda i, j: (i, j)),
                   pl.BlockSpec((1, 2, bc), lambda i, j: (i, 0, j))),
        out_shape=(jax.ShapeDtypeStruct((m_pad, cpad), jnp.bfloat16),
                   jax.ShapeDtypeStruct((grid_m, 2, cpad), jnp.float32)),
        compiler_params=cparams,
    )(xs, w, b_p)

    if batch_norm:
        # Finalize global (biased) per-channel stats from the tiny per-tile partials (O(Cout)).
        s = jnp.sum(stats[:, 0, :], axis=0)
        ss = jnp.sum(stats[:, 1, :], axis=0)
        mean = s / M
        var = jnp.maximum(ss / M - mean * mean, 0.0)
        inv = jax.lax.rsqrt(var + 1e-5)
        scale = (g_p * inv).reshape(1, cpad)
        shift = (be_p - mean * g_p * inv).reshape(1, cpad)

        out = pl.pallas_call(
            bn_scale_shift_kernel,
            grid=(grid_m, grid_c),
            in_specs=[pl.BlockSpec((bm, bc), lambda i, j: (i, j)),
                      pl.BlockSpec((1, bc), lambda i, j: (0, j)),
                      pl.BlockSpec((1, bc), lambda i, j: (0, j))],
            out_specs=pl.BlockSpec((bm, bc), lambda i, j: (i, j)),
            out_shape=jax.ShapeDtypeStruct((m_pad, cpad), out_dtype),
            compiler_params=cparams,
        )(y, scale, shift)
    else:
        out = y.astype(out_dtype)

    return out[:M, :Cout].reshape(N, H, W, Cout)


def unet_conv_block(x_nchw, params, padding=True, batch_norm=True, block_m=512):
    """params: list of tuples (w_torch (Cout,Cin,3,3), bias (Cout,), gamma (Cout,), beta (Cout,))."""
    pad = 1 if padding else 0
    x = jnp.transpose(x_nchw, (0, 2, 3, 1))  # NCHW -> NHWC
    n_stages = len(params)
    for si, (w_t, b, g, be) in enumerate(params):
        w_hwio = jnp.transpose(w_t, (2, 3, 1, 0))  # (Cout,Cin,3,3) -> (3,3,Cin,Cout)
        is_last = si == n_stages - 1
        x = _conv_relu_bn_stage(
            x, w_hwio, b, g, be, pad, batch_norm,
            block_m=block_m,
            out_dtype=jnp.float32 if is_last else jnp.bfloat16)
    return jnp.transpose(x, (0, 3, 1, 2))  # NHWC -> NCHW


# --------------------------- pure-JAX references -------------------------------
def unet_conv_block_ref(x_nchw, params, padding=True, batch_norm=True, emulate_bf16=True):
    """Reference. emulate_bf16=True rounds matmul operands / intermediates to bf16 like the kernel."""
    pad = 1 if padding else 0
    x = jnp.transpose(x_nchw, (0, 2, 3, 1))
    for (w_t, b, g, be) in params:
        w_hwio = jnp.transpose(w_t, (2, 3, 1, 0))
        if emulate_bf16:
            xin = x.astype(jnp.bfloat16).astype(jnp.float32)
            w = w_hwio.astype(jnp.bfloat16).astype(jnp.float32)
        else:
            xin, w = x, w_hwio
        y = jax.lax.conv_general_dilated(
            xin, w, (1, 1), [(pad, pad), (pad, pad)],
            dimension_numbers=("NHWC", "HWIO", "NHWC"),
            precision=jax.lax.Precision.HIGHEST)
        y = jnp.maximum(y + b, 0.0)
        if batch_norm:
            mean = jnp.mean(y, axis=(0, 1, 2), keepdims=True)
            var = jnp.mean((y - mean) ** 2, axis=(0, 1, 2), keepdims=True)
            y = (y - mean) * jax.lax.rsqrt(var + 1e-5) * g + be
        x = y
    return jnp.transpose(x, (0, 3, 1, 2))


# ------------------------------------ main -------------------------------------
if __name__ == "__main__":
    key = jax.random.PRNGKey(0)
    keys = jax.random.split(key, 10)

    N, Cin, H, W = 2, 4, 16, 16       # matches UNetConvBlock(in_size=4, out_size=8, ...)
    Cout = 8

    x = jax.random.normal(keys[0], (N, Cin, H, W), jnp.float32)

    w1 = 0.1 * jax.random.normal(keys[1], (Cout, Cin, 3, 3), jnp.float32)
    b1 = 0.1 * jax.random.normal(keys[2], (Cout,), jnp.float32)
    g1 = 1.0 + 0.1 * jax.random.normal(keys[3], (Cout,), jnp.float32)
    be1 = 0.1 * jax.random.normal(keys[4], (Cout,), jnp.float32)
    w2 = 0.1 * jax.random.normal(keys[5], (Cout, Cout, 3, 3), jnp.float32)
    b2 = 0.1 * jax.random.normal(keys[6], (Cout,), jnp.float32)
    g2 = 1.0 + 0.1 * jax.random.normal(keys[7], (Cout,), jnp.float32)
    be2 = 0.1 * jax.random.normal(keys[8], (Cout,), jnp.float32)
    params = [(w1, b1, g1, be1), (w2, b2, g2, be2)]

    fwd = jax.jit(unet_conv_block, static_argnames=("padding", "batch_norm", "block_m"))

    # Case 1: padding=True, batch_norm=True (small block_m so the grid has >1 step).
    out = jax.block_until_ready(fwd(x, params, padding=True, batch_norm=True, block_m=128))
    assert out.shape == (N, Cout, H, W), out.shape
    ref_bf16 = np.asarray(unet_conv_block_ref(x, params, True, True, emulate_bf16=True))
    ref_f32 = np.asarray(unet_conv_block_ref(x, params, True, True, emulate_bf16=False))
    # Check against a reference with matching bf16 operand rounding (kernel additionally keeps
    # the pre-BN activation in bf16, hence the slightly looser-than-exact tolerance).
    np.testing.assert_allclose(np.asarray(out), ref_bf16, rtol=2e-2, atol=2e-2)
    # Loose check against the full-f32 PyTorch-equivalent math (bf16 MXU operands).
    np.testing.assert_allclose(np.asarray(out), ref_f32, rtol=5e-2, atol=5e-2)

    # Case 2: padding=False, batch_norm=False — exercises masked partial tiles & the no-BN path.
    out2 = jax.block_until_ready(fwd(x, params, padding=False, batch_norm=False, block_m=128))
    assert out2.shape == (N, Cout, H - 4, W - 4), out2.shape
    ref2 = np.asarray(unet_conv_block_ref(x, params, False, False, emulate_bf16=True))
    np.testing.assert_allclose(np.asarray(out2), ref2, rtol=2e-2, atol=2e-2)

    print("KERNEL_OK")
</pallas_src>

<mosaic_0001>
module attributes {stable_mosaic.version = 11 : i64} {
  func.func @conv_relu_stats_kernel(%arg0: i32, %arg1: i32, %arg2: memref<128x36xbf16, #tpu.memory_space<vmem>>, %arg3: memref<36x128xbf16, #tpu.memory_space<vmem>>, %arg4: memref<1x128xf32, #tpu.memory_space<vmem>>, %arg5: memref<128x128xbf16, #tpu.memory_space<vmem>>, %arg6: memref<1x2x128xf32, #tpu.memory_space<vmem>>) attributes {dimension_semantics = [#tpu.dimension_semantics<parallel>, #tpu.dimension_semantics<parallel>], iteration_bounds = array<i64: 4, 1>, scalar_prefetch = 0 : i64, scratch_operands = 0 : i64, tpu.core_type = #tpu.core_type<tc>, window_params = [{transform_indices = @transform_0, window_bounds = array<i64: 128, 36>}, {transform_indices = @transform_1, window_bounds = array<i64: 36, 128>}, {transform_indices = @transform_2, window_bounds = array<i64: 1, 128>}, {transform_indices = @transform_3, window_bounds = array<i64: 128, 128>}, {transform_indices = @transform_4, window_bounds = array<i64: 1, 2, 128>}]} {
    %c0 = arith.constant 0 : index
    %c0_0 = arith.constant 0 : index
    %0 = vector.load %arg2[%c0, %c0_0] : memref<128x36xbf16, #tpu.memory_space<vmem>>, vector<128x36xbf16>
    %c0_1 = arith.constant 0 : index
    %c0_2 = arith.constant 0 : index
    %1 = vector.load %arg3[%c0_1, %c0_2] : memref<36x128xbf16, #tpu.memory_space<vmem>>, vector<36x128xbf16>
    %cst = arith.constant dense<0.000000e+00> : vector<128x128xf32>
    %2 = tpu.matmul %0, %1, %cst {dimension_numbers = #tpu.dot_dimension_numbers<[1], [0], [0], [1], [0, 0, 1, 1], [], []>} : vector<128x36xbf16>, vector<36x128xbf16>, vector<128x128xf32> -> vector<128x128xf32>
    %c0_3 = arith.constant 0 : index
    %c0_4 = arith.constant 0 : index
    %3 = vector.load %arg4[%c0_3, %c0_4] : memref<1x128xf32, #tpu.memory_space<vmem>>, vector<1x128xf32>
    %4 = vector.broadcast %3 : vector<1x128xf32> to vector<128x128xf32>
    %5 = arith.addf %2, %4 : vector<128x128xf32>
    %cst_5 = arith.constant 0.000000e+00 : f32
    %6 = vector.broadcast %cst_5 : f32 to vector<128x128xf32>
    %7 = arith.maximumf %5, %6 : vector<128x128xf32>
    %8 = arith.truncf %7 : vector<128x128xf32> to vector<128x128xbf16>
    %c0_6 = arith.constant 0 : index
    %c0_7 = arith.constant 0 : index
    %9 = vector.load %arg5[%c0_6, %c0_7] : memref<128x128xbf16, #tpu.memory_space<vmem>>, vector<128x128xbf16>
    tpu.vector_store %arg5[%c0_6, %c0_7], %8 {strides = array<i32>} : memref<128x128xbf16, #tpu.memory_space<vmem>>, vector<128x128xbf16>,
    %c128_i32 = arith.constant 128 : i32
    %10 = arith.muli %arg0, %c128_i32 : i32
    %11 = tpu.iota {dimensions = array<i32: 0>} : vector<128x1xi32>
    %12 = vector.broadcast %10 : i32 to vector<128x1xi32>
    %13 = arith.addi %12, %11 : vector<128x1xi32>
    %c512_i32 = arith.constant 512 : i32
    %14 = vector.broadcast %c512_i32 : i32 to vector<128x1xi32>
    %15 = arith.cmpi slt, %13, %14 : vector<128x1xi32>
    %16 = arith.extui %15 : vector<128x1xi1> to vector<128x1xi32>
    %17 = arith.sitofp %16 : vector<128x1xi32> to vector<128x1xf32>
    %18 = vector.broadcast %17 : vector<128x1xf32> to vector<128x128xf32>
    %19 = arith.mulf %7, %18 : vector<128x128xf32>
    %cst_8 = arith.constant dense<0.000000e+00> : vector<128xf32>
    %20 = vector.multi_reduction <add>, %19, %cst_8 [0] : vector<128x128xf32> to vector<128xf32>
    %21 = vector.shape_cast %20 : vector<128xf32> to vector<1x128xf32>
    %22 = arith.mulf %19, %19 : vector<128x128xf32>
    %cst_9 = arith.constant dense<0.000000e+00> : vector<128xf32>
    %23 = vector.multi_reduction <add>, %22, %cst_9 [0] : vector<128x128xf32> to vector<128xf32>
    %24 = vector.shape_cast %23 : vector<128xf32> to vector<1x128xf32>
    %25 = tpu.concatenate %21, %24 in 0 : vector<1x128xf32>, vector<1x128xf32> -> vector<2x128xf32>
    %26 = vector.shape_cast %25 : vector<2x128xf32> to vector<1x2x128xf32>
    %c0_10 = arith.constant 0 : index
    %c0_11 = arith.constant 0 : index
    %c0_12 = arith.constant 0 : index
    %27 = vector.load %arg6[%c0_10, %c0_11, %c0_12] : memref<1x2x128xf32, #tpu.memory_space<vmem>>, vector<1x2x128xf32>
    tpu.vector_store %arg6[%c0_10, %c0_11, %c0_12], %26 {strides = array<i32>} : memref<1x2x128xf32, #tpu.memory_space<vmem>>, vector<1x2x128xf32>,
    return
  }
  func.func @transform_0(%arg0: i32, %arg1: i32) -> (i32, i32) {
    %c0_i32 = arith.constant 0 : i32
    %c0_i32_0 = arith.constant 0 : i32
    return %arg0, %c0_i32 : i32, i32
  }
  func.func @transform_1(%arg0: i32, %arg1: i32) -> (i32, i32) {
    %c0_i32 = arith.constant 0 : i32
    %c0_i32_0 = arith.constant 0 : i32
    return %c0_i32, %arg1 : i32, i32
  }
  func.func @transform_2(%arg0: i32, %arg1: i32) -> (i32, i32) {
    %c0_i32 = arith.constant 0 : i32
    %c0_i32_0 = arith.constant 0 : i32
    return %c0_i32, %arg1 : i32, i32
  }
  func.func @transform_3(%arg0: i32, %arg1: i32) -> (i32, i32) {
    %c0_i32 = arith.constant 0 : i32
    return %arg0, %arg1 : i32, i32
  }
  func.func @transform_4(%arg0: i32, %arg1: i32) -> (i32, i32, i32) {
    %c0_i32 = arith.constant 0 : i32
    %c0_i32_0 = arith.constant 0 : i32
    return %arg0, %c0_i32, %arg1 : i32, i32, i32
  }
}

module attributes {stable_mosaic.version = 11 : i64} {
  func.func @bn_scale_shift_kernel(%arg0: i32, %arg1: i32, %arg2: memref<128x128xbf16, #tpu.memory_space<vmem>>, %arg3: memref<1x128xf32, #tpu.memory_space<vmem>>, %arg4: memref<1x128xf32, #tpu.memory_space<vmem>>, %arg5: memref<128x128xbf16, #tpu.memory_space<vmem>>) attributes {dimension_semantics = [#tpu.dimension_semantics<parallel>, #tpu.dimension_semantics<parallel>], iteration_bounds = array<i64: 4, 1>, scalar_prefetch = 0 : i64, scratch_operands = 0 : i64, tpu.core_type = #tpu.core_type<tc>, window_params = [{transform_indices = @transform_0, window_bounds = array<i64: 128, 128>}, {transform_indices = @transform_1, window_bounds = array<i64: 1, 128>}, {transform_indices = @transform_2, window_bounds = array<i64: 1, 128>}, {transform_indices = @transform_3, window_bounds = array<i64: 128, 128>}]} {
    %c0 = arith.constant 0 : index
    %c0_0 = arith.constant 0 : index
    %0 = vector.load %arg2[%c0, %c0_0] : memref<128x128xbf16, #tpu.memory_space<vmem>>, vector<128x128xbf16>
    %1 = arith.extf %0 : vector<128x128xbf16> to vector<128x128xf32>
    %c0_1 = arith.constant 0 : index
    %c0_2 = arith.constant 0 : index
    %2 = vector.load %arg3[%c0_1, %c0_2] : memref<1x128xf32, #tpu.memory_space<vmem>>, vector<1x128xf32>
    %3 = vector.broadcast %2 : vector<1x128xf32> to vector<128x128xf32>
    %4 = arith.mulf %1, %3 : vector<128x128xf32>
    %c0_3 = arith.constant 0 : index
    %c0_4 = arith.constant 0 : index
    %5 = vector.load %arg4[%c0_3, %c0_4] : memref<1x128xf32, #tpu.memory_space<vmem>>, vector<1x128xf32>
    %6 = vector.broadcast %5 : vector<1x128xf32> to vector<128x128xf32>
    %7 = arith.addf %4, %6 : vector<128x128xf32>
    %8 = arith.truncf %7 : vector<128x128xf32> to vector<128x128xbf16>
    %c0_5 = arith.constant 0 : index
    %c0_6 = arith.constant 0 : index
    %9 = vector.load %arg5[%c0_5, %c0_6] : memref<128x128xbf16, #tpu.memory_space<vmem>>, vector<128x128xbf16>
    tpu.vector_store %arg5[%c0_5, %c0_6], %8 {strides = array<i32>} : memref<128x128xbf16, #tpu.memory_space<vmem>>, vector<128x128xbf16>,
    return
  }
  func.func @transform_0(%arg0: i32, %arg1: i32) -> (i32, i32) {
    %c0_i32 = arith.constant 0 : i32
    return %arg0, %arg1 : i32, i32
  }
  func.func @transform_1(%arg0: i32, %arg1: i32) -> (i32, i32) {
    %c0_i32 = arith.constant 0 : i32
    %c0_i32_0 = arith.constant 0 : i32
    return %c0_i32, %arg1 : i32, i32
  }
  func.func @transform_2(%arg0: i32, %arg1: i32) -> (i32, i32) {
    %c0_i32 = arith.constant 0 : i32
    %c0_i32_0 = arith.constant 0 : i32
    return %c0_i32, %arg1 : i32, i32
  }
  func.func @transform_3(%arg0: i32, %arg1: i32) -> (i32, i32) {
    %c0_i32 = arith.constant 0 : i32
    return %arg0, %arg1 : i32, i32
  }
}

module attributes {stable_mosaic.version = 11 : i64} {
  func.func @conv_relu_stats_kernel(%arg0: i32, %arg1: i32, %arg2: memref<128x72xbf16, #tpu.memory_space<vmem>>, %arg3: memref<72x128xbf16, #tpu.memory_space<vmem>>, %arg4: memref<1x128xf32, #tpu.memory_space<vmem>>, %arg5: memref<128x128xbf16, #tpu.memory_space<vmem>>, %arg6: memref<1x2x128xf32, #tpu.memory_space<vmem>>) attributes {dimension_semantics = [#tpu.dimension_semantics<parallel>, #tpu.dimension_semantics<parallel>], iteration_bounds = array<i64: 4, 1>, scalar_prefetch = 0 : i64, scratch_operands = 0 : i64, tpu.core_type = #tpu.core_type<tc>, window_params = [{transform_indices = @transform_0, window_bounds = array<i64: 128, 72>}, {transform_indices = @transform_1, window_bounds = array<i64: 72, 128>}, {transform_indices = @transform_2, window_bounds = array<i64: 1, 128>}, {transform_indices = @transform_3, window_bounds = array<i64: 128, 128>}, {transform_indices = @transform_4, window_bounds = array<i64: 1, 2, 128>}]} {
    %c0 = arith.constant 0 : index
    %c0_0 = arith.constant 0 : index
    %0 = vector.load %arg2[%c0, %c0_0] : memref<128x72xbf16, #tpu.memory_space<vmem>>, vector<128x72xbf16>
    %c0_1 = arith.constant 0 : index
    %c0_2 = arith.constant 0 : index
    %1 = vector.load %arg3[%c0_1, %c0_2] : memref<72x128xbf16, #tpu.memory_space<vmem>>, vector<72x128xbf16>
    %cst = arith.constant dense<0.000000e+00> : vector<128x128xf32>
    %2 = tpu.matmul %0, %1, %cst {dimension_numbers = #tpu.dot_dimension_numbers<[1], [0], [0], [1], [0, 0, 1, 1], [], []>} : vector<128x72xbf16>, vector<72x128xbf16>, vector<128x128xf32> -> vector<128x128xf32>
    %c0_3 = arith.constant 0 : index
    %c0_4 = arith.constant 0 : index
    %3 = vector.load %arg4[%c0_3, %c0_4] : memref<1x128xf32, #tpu.memory_space<vmem>>, vector<1x128xf32>
    %4 = vector.broadcast %3 : vector<1x128xf32> to vector<128x128xf32>
    %5 = arith.addf %2, %4 : vector<128x128xf32>
    %cst_5 = arith.constant 0.000000e+00 : f32
    %6 = vector.broadcast %cst_5 : f32 to vector<128x128xf32>
    %7 = arith.maximumf %5, %6 : vector<128x128xf32>
    %8 = arith.truncf %7 : vector<128x128xf32> to vector<128x128xbf16>
    %c0_6 = arith.constant 0 : index
    %c0_7 = arith.constant 0 : index
    %9 = vector.load %arg5[%c0_6, %c0_7] : memref<128x128xbf16, #tpu.memory_space<vmem>>, vector<128x128xbf16>
    tpu.vector_store %arg5[%c0_6, %c0_7], %8 {strides = array<i32>} : memref<128x128xbf16, #tpu.memory_space<vmem>>, vector<128x128xbf16>,
    %c128_i32 = arith.constant 128 : i32
    %10 = arith.muli %arg0, %c128_i32 : i32
    %11 = tpu.iota {dimensions = array<i32: 0>} : vector<128x1xi32>
    %12 = vector.broadcast %10 : i32 to vector<128x1xi32>
    %13 = arith.addi %12, %11 : vector<128x1xi32>
    %c512_i32 = arith.constant 512 : i32
    %14 = vector.broadcast %c512_i32 : i32 to vector<128x1xi32>
    %15 = arith.cmpi slt, %13, %14 : vector<128x1xi32>
    %16 = arith.extui %15 : vector<128x1xi1> to vector<128x1xi32>
    %17 = arith.sitofp %16 : vector<128x1xi32> to vector<128x1xf32>
    %18 = vector.broadcast %17 : vector<128x1xf32> to vector<128x128xf32>
    %19 = arith.mulf %7, %18 : vector<128x128xf32>
    %cst_8 = arith.constant dense<0.000000e+00> : vector<128xf32>
    %20 = vector.multi_reduction <add>, %19, %cst_8 [0] : vector<128x128xf32> to vector<128xf32>
    %21 = vector.shape_cast %20 : vector<128xf32> to vector<1x128xf32>
    %22 = arith.mulf %19, %19 : vector<128x128xf32>
    %cst_9 = arith.constant dense<0.000000e+00> : vector<128xf32>
    %23 = vector.multi_reduction <add>, %22, %cst_9 [0] : vector<128x128xf32> to vector<128xf32>
    %24 = vector.shape_cast %23 : vector<128xf32> to vector<1x128xf32>
    %25 = tpu.concatenate %21, %24 in 0 : vector<1x128xf32>, vector<1x128xf32> -> vector<2x128xf32>
    %26 = vector.shape_cast %25 : vector<2x128xf32> to vector<1x2x128xf32>
    %c0_10 = arith.constant 0 : index
    %c0_11 = arith.constant 0 : index
    %c0_12 = arith.constant 0 : index
    %27 = vector.load %arg6[%c0_10, %c0_11, %c0_12] : memref<1x2x128xf32, #tpu.memory_space<vmem>>, vector<1x2x128xf32>
    tpu.vector_store %arg6[%c0_10, %c0_11, %c0_12], %26 {strides = array<i32>} : memref<1x2x128xf32, #tpu.memory_space<vmem>>, vector<1x2x128xf32>,
    return
  }
  func.func @transform_0(%arg0: i32, %arg1: i32) -> (i32, i32) {
    %c0_i32 = arith.constant 0 : i32
    %c0_i32_0 = arith.constant 0 : i32
    return %arg0, %c0_i32 : i32, i32
  }
  func.func @transform_1(%arg0: i32, %arg1: i32) -> (i32, i32) {
    %c0_i32 = arith.constant 0 : i32
    %c0_i32_0 = arith.constant 0 : i32
    return %c0_i32, %arg1 : i32, i32
  }
  func.func @transform_2(%arg0: i32, %arg1: i32) -> (i32, i32) {
    %c0_i32 = arith.constant 0 : i32
    %c0_i32_0 = arith.constant 0 : i32
    return %c0_i32, %arg1 : i32, i32
  }
  func.func @transform_3(%arg0: i32, %arg1: i32) -> (i32, i32) {
    %c0_i32 = arith.constant 0 : i32
    return %arg0, %arg1 : i32, i32
  }
  func.func @transform_4(%arg0: i32, %arg1: i32) -> (i32, i32, i32) {
    %c0_i32 = arith.constant 0 : i32
    %c0_i32_0 = arith.constant 0 : i32
    return %arg0, %c0_i32, %arg1 : i32, i32, i32
  }
}

module attributes {stable_mosaic.version = 11 : i64} {
  func.func @bn_scale_shift_kernel(%arg0: i32, %arg1: i32, %arg2: memref<128x128xbf16, #tpu.memory_space<vmem>>, %arg3: memref<1x128xf32, #tpu.memory_space<vmem>>, %arg4: memref<1x128xf32, #tpu.memory_space<vmem>>, %arg5: memref<128x128xf32, #tpu.memory_space<vmem>>) attributes {dimension_semantics = [#tpu.dimension_semantics<parallel>, #tpu.dimension_semantics<parallel>], iteration_bounds = array<i64: 4, 1>, scalar_prefetch = 0 : i64, scratch_operands = 0 : i64, tpu.core_type = #tpu.core_type<tc>, window_params = [{transform_indices = @transform_0, window_bounds = array<i64: 128, 128>}, {transform_indices = @transform_1, window_bounds = array<i64: 1, 128>}, {transform_indices = @transform_2, window_bounds = array<i64: 1, 128>}, {transform_indices = @transform_3, window_bounds = array<i64: 128, 128>}]} {
    %c0 = arith.constant 0 : index
    %c0_0 = arith.constant 0 : index
    %0 = vector.load %arg2[%c0, %c0_0] : memref<128x128xbf16, #tpu.memory_space<vmem>>, vector<128x128xbf16>
    %1 = arith.extf %0 : vector<128x128xbf16> to vector<128x128xf32>
    %c0_1 = arith.constant 0 : index
    %c0_2 = arith.constant 0 : index
    %2 = vector.load %arg3[%c0_1, %c0_2] : memref<1x128xf32, #tpu.memory_space<vmem>>, vector<1x128xf32>
    %3 = vector.broadcast %2 : vector<1x128xf32> to vector<128x128xf32>
    %4 = arith.mulf %1, %3 : vector<128x128xf32>
    %c0_3 = arith.constant 0 : index
    %c0_4 = arith.constant 0 : index
    %5 = vector.load %arg4[%c0_3, %c0_4] : memref<1x128xf32, #tpu.memory_space<vmem>>, vector<1x128xf32>
    %6 = vector.broadcast %5 : vector<1x128xf32> to vector<128x128xf32>
    %7 = arith.addf %4, %6 : vector<128x128xf32>
    %c0_5 = arith.constant 0 : index
    %c0_6 = arith.constant 0 : index
    %8 = vector.load %arg5[%c0_5, %c0_6] : memref<128x128xf32, #tpu.memory_space<vmem>>, vector<128x128xf32>
    tpu.vector_store %arg5[%c0_5, %c0_6], %7 {strides = array<i32>} : memref<128x128xf32, #tpu.memory_space<vmem>>, vector<128x128xf32>,
    return
  }
  func.func @transform_0(%arg0: i32, %arg1: i32) -> (i32, i32) {
    %c0_i32 = arith.constant 0 : i32
    return %arg0, %arg1 : i32, i32
  }
  func.func @transform_1(%arg0: i32, %arg1: i32) -> (i32, i32) {
    %c0_i32 = arith.constant 0 : i32
    %c0_i32_0 = arith.constant 0 : i32
    return %c0_i32, %arg1 : i32, i32
  }
  func.func @transform_2(%arg0: i32, %arg1: i32) -> (i32, i32) {
    %c0_i32 = arith.constant 0 : i32
    %c0_i32_0 = arith.constant 0 : i32
    return %c0_i32, %arg1 : i32, i32
  }
  func.func @transform_3(%arg0: i32, %arg1: i32) -> (i32, i32) {
    %c0_i32 = arith.constant 0 : i32
    return %arg0, %arg1 : i32, i32
  }
}

</mosaic_0001>

<bundles_post_ra>
// kernel: unet_conv_block.5
= control target key start
LH: loop header
LB: loop body
LE: loop exit
PB: predicated region body
PF: predicated region fallthrough
CT: control target
= control target key end

     0   :  { %s694_s12 = smov 0   ;;  %s696_s13 = smov 0   ;;  %s760_s0 = inlined_call_operand.vmem [shape: bf16[512,128], index: 0, kind: input, shape index: {}]   ;;  %s761_s1 = inlined_call_operand.vmem [shape: f32[1,128], index: 1, kind: input, shape index: {}]   ;;  %s762_s2 = inlined_call_operand.vmem [shape: f32[1,128], index: 2, kind: input, shape index: {}]   ;;  %s763_s3 = inlined_call_operand.vmem [shape: bf16[512,128], index: 3, kind: output, shape index: {}]  }
   0x1   :  { %s698_s14 = smov 0  }
   0x2 LB: > { %s25_s15 = sadd.s32 1, %s668_s13  ;;  %p499_p0 = scmp.ge.s32.totalorder %s672_s14, 1  ;;  %s672_s14 = sphi %s698_s14, %s13_s14   ;;  %s668_s13 = sphi %s696_s13, %s765_s13   ;;  %s664_s12 = sphi %s694_s12, %s764_s12  }
   0x3   : > { %p27_p1 = scmp.ge.s32.totalorder %s25_s15, 4  ;;  %p173_p2 = scmp.lt.s32.totalorder %s672_s14, 5 }
   0x5   : > { %s767_s15 = smov (%p27_p1, %s25_s15), 0  ;;  %p174_p3 = pnand %p499_p0, %p173_p2 }
   0x6   : > { %s500_s16 = sshll.u32 (!%p174_p3), %s664_s12, 4  ;;  %v504_v0 = vld [vmem:[%s761_s1] ss:$0 sm:$0xff] (!%p174_p3) }
   0x7   : > { %177 = sbr.rel (%p174_p3) target bundleno = 36 (0x24), region = 32  ;;  %p210_p4 = scmp.lt.s32.totalorder (!%p174_p3), %s500_s16, 63  ;;  %v505_v9 = vld [vmem:[%s762_s2] ss:$0 sm:$0xff] (!%p174_p3) }
   0xe   : > { %s769_s16 = smov (!%p210_p4, %s500_s16), 63 }
   0xf   : > { %s501_s17 = sshll.u32 %s769_s16, 2 }
  0x10   : > { %s720_s20 = scalar_lea.vmem %s760_s0, %s501_s17  ;;  %s739_s27 = scalar_lea.vmem %s763_s3, %s501_s17 }
  0x11   : > { %v541_v1 = vld [vmem:[%s720_s20] sm:$0xff]   ;;  %v612_v2 = vld [vmem:[%s720_s20 + $0x8] sm:$0xff]   ;;  %v613_v3 = vld [vmem:[%s720_s20 + $0x10] sm:$0xff]  }
  0x12   : > { %v542_v4 = vunpack.c.l.bf16 %v541_v1  ;;  %v543_v5 = vunpack.c.h.bf16 %v541_v1  ;;  %v546_v6 = vunpack.c.l.bf16 %v612_v2  ;;  %v547_v7 = vunpack.c.h.bf16 %v612_v2  ;;  %v614_v8 = vld [vmem:[%s720_s20 + $0x18] sm:$0xff]   ;;  %v615_v22 = vld [vmem:[%s720_s20 + $0x20] sm:$0xff]   ;;  %v616_v27 = vld [vmem:[%s720_s20 + $0x28] sm:$0xff]  }
  0x13   : > { %v550_v10 = vunpack.c.l.bf16 %v613_v3  ;;  %v551_v11 = vunpack.c.h.bf16 %v613_v3  ;;  %v554_v12 = vunpack.c.l.bf16 %v614_v8  ;;  %v555_v13 = vunpack.c.h.bf16 %v614_v8  ;;  %v617_v32 = vld [vmem:[%s720_s20 + $0x30] sm:$0xff]   ;;  %v618_v37 = vld [vmem:[%s720_s20 + $0x38] sm:$0xff]  }
  0x14   : > { %v272_v14 = vmul.f32 %v542_v4, %v504_v0  ;;  %v273_v15 = vmul.f32 %v543_v5, %v504_v0  ;;  %v274_v16 = vmul.f32 %v546_v6, %v504_v0  ;;  %v275_v17 = vmul.f32 %v547_v7, %v504_v0 }
  0x15   : > { %v276_v18 = vmul.f32 %v550_v10, %v504_v0  ;;  %v277_v19 = vmul.f32 %v551_v11, %v504_v0  ;;  %v278_v20 = vmul.f32 %v554_v12, %v504_v0  ;;  %v279_v21 = vmul.f32 %v555_v13, %v504_v0 }
  0x16   : > { %v295_v23 = vadd.f32 %v505_v9, %v272_v14  ;;  %v296_v24 = vadd.f32 %v505_v9, %v273_v15  ;;  %v297_v25 = vadd.f32 %v505_v9, %v274_v16  ;;  %v298_v26 = vadd.f32 %v505_v9, %v275_v17 }
  0x17   : > { %v299_v28 = vadd.f32 %v505_v9, %v276_v18  ;;  %v300_v29 = vadd.f32 %v505_v9, %v277_v19  ;;  %v301_v30 = vadd.f32 %v505_v9, %v278_v20  ;;  %v302_v31 = vadd.f32 %v505_v9, %v279_v21 }
  0x18   : > { %v575_v33 = vpack.c.bf16 %v296_v24, %v295_v23  ;;  %v580_v34 = vpack.c.bf16 %v298_v26, %v297_v25  ;;  %v558_v35 = vunpack.c.l.bf16 %v615_v22  ;;  %v559_v36 = vunpack.c.h.bf16 %v615_v22 }
  0x19   : > { %v585_v38 = vpack.c.bf16 %v300_v29, %v299_v28  ;;  %v590_v39 = vpack.c.bf16 %v302_v31, %v301_v30  ;;  %v562_v40 = vunpack.c.l.bf16 %v616_v27  ;;  %v563_v41 = vunpack.c.h.bf16 %v616_v27 }
  0x1a   : > { %576 = vst [vmem:[%s739_s27] sm:$0xff] %v575_v33   ;;  %619 = vst [vmem:[%s739_s27 + $0x8] sm:$0xff] %v580_v34   ;;  %v280_v42 = vmul.f32 %v558_v35, %v504_v0  ;;  %v281_v43 = vmul.f32 %v559_v36, %v504_v0  ;;  %v566_v44 = vunpack.c.l.bf16 %v617_v32  ;;  %v567_v45 = vunpack.c.h.bf16 %v617_v32 }
  0x1b   : > { %620 = vst [vmem:[%s739_s27 + $0x10] sm:$0xff] %v585_v38   ;;  %621 = vst [vmem:[%s739_s27 + $0x18] sm:$0xff] %v590_v39   ;;  %v282_v46 = vmul.f32 %v562_v40, %v504_v0  ;;  %v283_v47 = vmul.f32 %v563_v41, %v504_v0  ;;  %v570_v48 = vunpack.c.l.bf16 %v618_v37  ;;  %v571_v49 = vunpack.c.h.bf16 %v618_v37 }
  0x1c   : > { %v303_v50 = vadd.f32 %v505_v9, %v280_v42  ;;  %v304_v51 = vadd.f32 %v505_v9, %v281_v43  ;;  %v284_v52 = vmul.f32 %v566_v44, %v504_v0  ;;  %v285_v53 = vmul.f32 %v567_v45, %v504_v0 }
  0x1d   : > { %v305_v54 = vadd.f32 %v505_v9, %v282_v46  ;;  %v306_v55 = vadd.f32 %v505_v9, %v283_v47  ;;  %v286_v56 = vmul.f32 %v570_v48, %v504_v0  ;;  %v287_v57 = vmul.f32 %v571_v49, %v504_v0 }
  0x1e   : > { %v595_v58 = vpack.c.bf16 %v304_v51, %v303_v50  ;;  %v307_v59 = vadd.f32 %v505_v9, %v284_v52  ;;  %v308_v60 = vadd.f32 %v505_v9, %v285_v53 }
  0x1f   : > { %v600_v61 = vpack.c.bf16 %v306_v55, %v305_v54  ;;  %v309_v62 = vadd.f32 %v505_v9, %v286_v56  ;;  %v310_v63 = vadd.f32 %v505_v9, %v287_v57 }
  0x20   : > { %622 = vst [vmem:[%s739_s27 + $0x20] sm:$0xff] %v595_v58   ;;  %v605_v1 = vpack.c.bf16 %v308_v60, %v307_v59 }
  0x21   : > { %623 = vst [vmem:[%s739_s27 + $0x28] sm:$0xff] %v600_v61   ;;  %v610_v2 = vpack.c.bf16 %v310_v63, %v309_v62 }
  0x22   : > { %624 = vst [vmem:[%s739_s27 + $0x30] sm:$0xff] %v605_v1  }
  0x23   : > { %625 = vst [vmem:[%s739_s27 + $0x38] sm:$0xff] %v610_v2  }
  0x24 PF: > { %s13_s14 = sadd.s32 1, %s672_s14   ;;  %s764_s12 = smov %s668_s13 }
  0x25   : > { %p10_p5 = scmp.ge.s32.totalorder %s13_s14, 6   ;;  %s765_s13 = smov %s767_s15 }
  0x27   :  { %12 = sbr.rel (!%p10_p5) target bundleno = 2 (0x2), region = 68 }

// kernel: unet_conv_block.4
= control target key start
LH: loop header
LB: loop body
LE: loop exit
PB: predicated region body
PF: predicated region fallthrough
CT: control target
= control target key end

     0   :  { %s1137_s15 = smov 0   ;;  %s1139_s16 = smov 0   ;;  %s1333_s0 = inlined_call_operand.vmem [shape: bf16[512,36], index: 0, kind: input, shape index: {}]   ;;  %s1334_s1 = inlined_call_operand.vmem [shape: bf16[36,128], index: 1, kind: input, shape index: {}]   ;;  %s1335_s2 = inlined_call_operand.vmem [shape: f32[1,128], index: 2, kind: input, shape index: {}]   ;;  %s1336_s3 = inlined_call_operand.vmem [shape: bf16[512,128], index: 3, kind: output, shape index: {0}]   ;;  %s1337_s4 = inlined_call_operand.vmem [shape: f32[4,2,128], index: 4, kind: output, shape index: {1}]  }
   0x1   :  { %s1141_s17 = smov 0  }
   0x2 LB: > { %s27_s18 = sadd.s32 1, %s1105_s16  ;;  %p886_p0 = scmp.ge.s32.totalorder %s1109_s17, 1  ;;  %s1109_s17 = sphi %s1141_s17, %s15_s17   ;;  %s1105_s16 = sphi %s1139_s16, %s1339_s16   ;;  %s1101_s15 = sphi %s1137_s15, %s1338_s15  }
   0x3   : > { %p29_p1 = scmp.ge.s32.totalorder %s27_s18, 4  ;;  %p199_p2 = scmp.lt.s32.totalorder %s1109_s17, 5 }
   0x5   : > { %s1341_s18 = smov (%p29_p1, %s27_s18), 0  ;;  %p200_p3 = pnand %p886_p0, %p199_p2 }
   0x6   : > { %v1076_v0 = vld [vmem:[%s1334_s1] sm:$0xff] (!%p200_p3)   ;;  %v1077_v1 = vld [vmem:[%s1334_s1 + $0x8] sm:$0xff] (!%p200_p3)   ;;  %s887_s23 = sshll.u32 (!%p200_p3), %s1101_s15, 4  ;;  %v1078_v2 = vld [vmem:[%s1334_s1 + $0x10] ss:$0 sps:$4 sm:$0x33] (!%p200_p3)   ;;  %v578_v12 = vlaneseq (!%p200_p3) }
   0x7   : > { %203 = sbr.rel (%p200_p3) target bundleno = 287 (0x11f), region = 32  ;;  %1021 = vmatprep.subr.bf16.mxu0 (!%p200_p3), %v1076_v0  ;;  %p243_p4 = scmp.lt.s32.totalorder (!%p200_p3), %s887_s23, 63  ;;  %1043 = vmatprep.subr.bf16.mxu1 (!%p200_p3), %v1076_v0  ;;  %vm380_vm0 = vcmask (!%p200_p3), 1041408   ;;  %vm355_vm1 = vcmask (!%p200_p3), 293888   ;;  %v1211_v34 = vld [vmem:[%s1335_s2] ss:$0 sm:$0xff] (!%p200_p3) }
   0x8   : > { %1022 = vmatpush3.bf16.msra.mxu0 (!%p200_p3), %v1076_v0  ;;  %1046 = vmatpush3.bf16.msra.mxu1 (!%p200_p3), %v1076_v0  ;;  %v382_v3 = vsel (!%p200_p3), %vm380_vm0, %v1078_v2, 0  ;;  %v1183_v13 = vshrl.u32 (!%p200_p3), %v578_v12, 7  ;;  %s928_s30 = sshll.u32 (!%p200_p3), %s1101_s15, 7  ;;  %v1111_v36 = vmov (!%p200_p3), 0.0   ;;  %p264_p5 = scmp.lt.s32.totalorder (!%p200_p3), %s1101_s15, 3 }
   0x9   : > { %1023 = vmatprep.subr.bf16.mxu0 (!%p200_p3), %v1077_v1  ;;  %1044 = vmatprep.subr.bf16.mxu1 (!%p200_p3), %v1077_v1  ;;  %v1187_v15 = vstv (!%p200_p3), %s928_s30 }
   0xa   : > { %v581_v14 = vadd.s32 (!%p200_p3), 16, %v1183_v13  ;;  %v582_v16 = vadd.s32 (!%p200_p3), 24, %v1183_v13  ;;  %v580_v17 = vadd.s32 (!%p200_p3), 8, %v1183_v13  ;;  %v585_v18 = vadd.s32 (!%p200_p3), 48, %v1183_v13 }
   0xb   : > { %v583_v19 = vadd.s32 (!%p200_p3), 32, %v1183_v13  ;;  %v586_v20 = vadd.s32 (!%p200_p3), 56, %v1183_v13  ;;  %v584_v21 = vadd.s32 (!%p200_p3), 40, %v1183_v13  ;;  %v596_v23 = vadd.s32 (!%p200_p3), %v1187_v15, %v1183_v13 }
   0xc   : > { %1024 = vmatpush3.bf16.msra.mxu0 (!%p200_p3), %v1077_v1  ;;  %1047 = vmatpush3.bf16.msra.mxu1 (!%p200_p3), %v1077_v1  ;;  %v598_v22 = vadd.s32 (!%p200_p3), %v1187_v15, %v581_v14  ;;  %v599_v24 = vadd.s32 (!%p200_p3), %v1187_v15, %v582_v16  ;;  %v597_v25 = vadd.s32 (!%p200_p3), %v1187_v15, %v580_v17  ;;  %v589_v29 = vadd.s32 (!%p200_p3), 80, %v1183_v13 }
   0xd   : > { %1049 = vmatprep.subr.msk.bf16.mxu0 (!%p200_p3), %vm380_vm0, %v1078_v2  ;;  %1050 = vmatprep.subr.msk.bf16.mxu1 (!%p200_p3), %vm380_vm0, %v1078_v2  ;;  %v602_v26 = vadd.s32 (!%p200_p3), %v1187_v15, %v585_v18  ;;  %v600_v27 = vadd.s32 (!%p200_p3), %v1187_v15, %v583_v19  ;;  %v603_v28 = vadd.s32 (!%p200_p3), %v1187_v15, %v586_v20  ;;  %v587_v31 = vadd.s32 (!%p200_p3), 64, %v1183_v13 }
   0xe   : > { %s1343_s23 = smov (!%p243_p4, %s887_s23), 63  ;;  %v601_v30 = vadd.s32 %v1187_v15, %v584_v21  ;;  %v590_v32 = vadd.s32 88, %v1183_v13  ;;  %vm614_vm2 = vcmp.lt.s32.totalorder %v598_v22, 512  ;;  %v588_v33 = vadd.s32 72, %v1183_v13  ;;  %s1345_s15 = smov (!%p264_p5, %s1101_s15), 3 }
   0xf   : > { %s888_s26 = sshll.u32 %s1343_s23, 2  ;;  %vm612_vm3 = vcmp.lt.s32.totalorder %v596_v23, 512  ;;  %vm615_vm4 = vcmp.lt.s32.totalorder %v599_v24, 512  ;;  %vm613_vm5 = vcmp.lt.s32.totalorder %v597_v25, 512  ;;  %vm618_vm6 = vcmp.lt.s32.totalorder %v602_v26, 512  ;;  %s891_s10 = sshll.u32 %s1345_s15, 1 }
  0x10   : > { %s246_s29 = scalar_lea.vmem %s1333_s0, %s888_s26  ;;  %1026 = vmatpush3.bf16.msra.mxu0 %v382_v3  ;;  %1048 = vmatpush3.bf16.msra.mxu1 %v382_v3  ;;  %vm616_vm7 = vcmp.lt.s32.totalorder %v600_v27, 512  ;;  %vm619_vm8 = vcmp.lt.s32.totalorder %v603_v28, 512  ;;  %v606_v35 = vadd.s32 %v1187_v15, %v589_v29  ;;  %v931_v37 = vsel %vm614_vm2, 1.0, %v1111_v36  ;;  %s1257_s9 = scalar_lea.vmem %s1336_s3, %s888_s26 }
  0x11   : > { %v1079_v4 = vld [vmem:[%s246_s29] sm:$0xff]   ;;  %v1080_v5 = vld [vmem:[%s246_s29 + $0x8] sm:$0xff]   ;;  %v1081_v6 = vld [vmem:[%s246_s29 + $0x10] sm:$0xff]   ;;  %vm617_vm9 = vcmp.lt.s32.totalorder %v601_v30, 512  ;;  %v604_v38 = vadd.s32 %v1187_v15, %v587_v31  ;;  %v607_v39 = vadd.s32 %v1187_v15, %v590_v32  ;;  %v929_v41 = vsel %vm612_vm3, 1.0, %v1111_v36  ;;  %s270_s13 = scalar_lea.vmem %s1337_s4, %s891_s10 }
  0x12   : > { %1027 = vmatprep.mubr.msk.bf16.mxu0 %vm355_vm1, %v1079_v4  ;;  %v1083_v7 = vld [vmem:[%s246_s29 + $0x20] sm:$0xff]   ;;  %v1084_v8 = vld [vmem:[%s246_s29 + $0x28] sm:$0xff]   ;;  %v1085_v9 = vld [vmem:[%s246_s29 + $0x30] sm:$0xff]   ;;  %v932_v42 = vsel %vm615_vm4, 1.0, %v1111_v36  ;;  %v930_v43 = vsel %vm613_vm5, 1.0, %v1111_v36  ;;  %v605_v44 = vadd.s32 %v1187_v15, %v588_v33  ;;  %v1224_v47 = vsel %vm618_vm6, 1.0, %v1111_v36 }
  0x13   : > { %1028 = vmatmul.mubr.msk.bf16.vlgmr.msra.gmra.mrb[0].mxu0 %vm355_vm1, %v1080_v5  ;;  %1035 = vmatprep.mubr.msk.bf16.mxu1 %vm355_vm1, %v1083_v7  ;;  %v1082_v10 = vld [vmem:[%s246_s29 + $0x18] sm:$0xff]   ;;  %v1228_v48 = vsel %vm616_vm7, 1.0, %v1111_v36  ;;  %v1232_v49 = vsel %vm619_vm8, 1.0, %v1111_v36  ;;  %v1237_v53 = vsel %vm617_vm9, 1.0, %v1111_v36  ;;  %vm622_vm10 = vcmp.lt.s32.totalorder %v606_v35, 512 }
  0x14   : > { %1031 = vmatprep.mubr.msk.bf16.mxu0 %vm355_vm1, %v1081_v6  ;;  %1036 = vmatmul.mubr.msk.bf16.vlgmr.msra.gmra.mrb[0].mxu1 %vm355_vm1, %v1084_v8  ;;  %v1086_v11 = vld [vmem:[%s246_s29 + $0x38] sm:$0xff]   ;;  %vm620_vm11 = vcmp.lt.s32.totalorder %v604_v38, 512  ;;  %vm623_vm12 = vcmp.lt.s32.totalorder %v607_v39, 512  ;;  %vm621_vm13 = vcmp.lt.s32.totalorder %v605_v44, 512  ;;  %v1249_v2 = vsel %vm622_vm10, 1.0, %v1111_v36 }
  0x15   : > { %1039 = vmatprep.mubr.msk.bf16.mxu1 %vm355_vm1, %v1085_v9  ;;  %v937_v6 = vsel %vm620_vm11, 1.0, %v1111_v36  ;;  %v1266_v17 = vsel %vm623_vm12, 1.0, %v1111_v36  ;;  %v1270_v18 = vsel %vm621_vm13, 1.0, %v1111_v36  ;;  %v591_v24 = vadd.s32 96, %v1183_v13 }
  0x16   : > { %vm734_vm2 = vcmask 1040384  }
  0x1b   : > { %1032 = vmatmul.mubr.msk.bf16.gmra.mrb[4].mxu0 %vm355_vm1, %v1082_v10 }
  0x1c   : > { %1040 = vmatmul.mubr.msk.bf16.gmra.mrb[4].mxu1 %vm355_vm1, %v1086_v11 }
  0xe6   : > { %v1029_v40 = vpop.f32.mrb[0].mxu0 }
  0xe7   : > { %v427_v45 = vadd.f32 %v1029_v40, %v1211_v34  ;;  %v418_v46 = vpop.f32.mrb[1].mxu0  ;;  %v1037_v50 = vpop.f32.mrb[0].mxu1 }
  0xe8   : > { %v419_v51 = vadd.f32 %v1211_v34, %v418_v46  ;;  %v1030_v52 = vpop.f32.mrb[2].mxu0  ;;  %v1240_v54 = vadd.f32 %v1037_v50, %v1211_v34  ;;  %v450_v55 = vpop.f32.mrb[1].mxu1 }
  0xe9   : > { %v483_v56 = vmax.f32 %v427_v45, 0.0  ;;  %v430_v57 = vadd.f32 %v1030_v52, %v1211_v34  ;;  %v421_v58 = vpop.f32.mrb[3].mxu0  ;;  %v1038_v59 = vpop.f32.mrb[2].mxu1  ;;  %v451_v3 = vadd.f32 %v1211_v34, %v450_v55 }
  0xea   : > { %v481_v60 = vmax.f32 %v419_v51, 0.0  ;;  %v422_v61 = vadd.f32 %v1211_v34, %v421_v58  ;;  %v1245_v62 = vadd.f32 %v1038_v59, %v1211_v34  ;;  %v453_v63 = vpop.f32.mrb[3].mxu1  ;;  %v491_v1 = vmax.f32 %v1240_v54, 0.0 }
  0xeb   : > { %v484_v0 = vmax.f32 %v430_v57, 0.0  ;;  %v662_v8 = vmul.f32 %v931_v37, %v483_v56  ;;  %v1262_v11 = vadd.f32 %v1211_v34, %v453_v63  ;;  %v489_v21 = vmax.f32 %v451_v3, 0.0 }
  0xec   : > { %v660_v4 = vmul.f32 %v929_v41, %v481_v60  ;;  %v482_v5 = vmax.f32 %v422_v61, 0.0  ;;  %v492_v7 = vmax.f32 %v1245_v62, 0.0  ;;  %v593_v58 = vadd.s32 112, %v1183_v13 }
  0xed   : > { %v971_v9 = vpack.c.bf16 %v484_v0, %v483_v56  ;;  %v663_v10 = vmul.f32 %v932_v42, %v484_v0  ;;  %v699_v31 = vmul.f32 %v662_v8, %v662_v8  ;;  %v490_v37 = vmax.f32 %v1262_v11, 0.0 }
  0xee   : > { %v966_v12 = vpack.c.bf16 %v482_v5, %v481_v60  ;;  %v661_v14 = vmul.f32 %v930_v43, %v482_v5  ;;  %v1033_v16 = vpop.f32.mrb[4].mxu0  ;;  %v991_v22 = vpack.c.bf16 %v492_v7, %v491_v1  ;;  %v697_v25 = vmul.f32 %v660_v4, %v660_v4 }
  0xef   : > { %1003 = vst [vmem:[%s1257_s9 + $0x8] sm:$0xff] %v971_v9   ;;  %v443_v19 = vadd.f32 %v1033_v16, %v1211_v34  ;;  %v434_v20 = vpop.f32.mrb[5].mxu0  ;;  %v1041_v23 = vpop.f32.mrb[4].mxu1  ;;  %v700_v32 = vmul.f32 %v663_v10, %v663_v10  ;;  %v986_v46 = vpack.c.bf16 %v490_v37, %v489_v21  ;;  %v608_v59 = vadd.s32 %v1187_v15, %v591_v24 }
  0xf0   : > { %967 = vst [vmem:[%s1257_s9] sm:$0xff] %v966_v12   ;;  %v676_v26 = vadd.f32 %v661_v14, %v660_v4  ;;  %v698_v27 = vmul.f32 %v661_v14, %v661_v14  ;;  %v435_v28 = vadd.f32 %v1211_v34, %v434_v20  ;;  %v1034_v29 = vpop.f32.mrb[6].mxu0  ;;  %v466_v30 = vpop.f32.mrb[5].mxu1  ;;  %1007 = vst [vmem:[%s1257_s9 + $0x28] sm:$0xff] %v991_v22   ;;  %v592_v60 = vadd.s32 104, %v1183_v13 }
  0xf1   : > { %v446_v33 = vadd.f32 %v1034_v29, %v1211_v34  ;;  %v437_v35 = vpop.f32.mrb[7].mxu0  ;;  %v1042_v38 = vpop.f32.mrb[6].mxu1  ;;  %v487_v44 = vmax.f32 %v443_v19, 0.0  ;;  %v1286_v50 = vadd.f32 %v1041_v23, %v1211_v34  ;;  %1006 = vst [vmem:[%s1257_s9 + $0x20] sm:$0xff] %v986_v46   ;;  %v668_v5 = vmul.f32 %v937_v6, %v489_v21 }
  0xf2   : > { %v677_v39 = vadd.f32 %v676_v26, %v662_v8  ;;  %v713_v40 = vadd.f32 %v698_v27, %v697_v25  ;;  %v485_v41 = vmax.f32 %v435_v28, 0.0  ;;  %v438_v42 = vadd.f32 %v1211_v34, %v437_v35  ;;  %v469_v43 = vpop.f32.mrb[7].mxu1 }
  0xf3   : > { %v488_v45 = vmax.f32 %v446_v33, 0.0  ;;  %v666_v4 = vmul.f32 %v1224_v47, %v487_v44  ;;  %v495_v8 = vmax.f32 %v1286_v50, 0.0  ;;  %v478_v11 = vadd.f32 %v1042_v38, %v1211_v34 }
  0xf4   : > { %v714_v51 = vadd.f32 %v713_v40, %v699_v31  ;;  %v664_v52 = vmul.f32 %v1228_v48, %v485_v41  ;;  %v678_v55 = vadd.f32 %v677_v39, %v663_v10  ;;  %v486_v56 = vmax.f32 %v438_v42, 0.0 }
  0xf5   : > { %v981_v57 = vpack.c.bf16 %v488_v45, %v487_v44  ;;  %v467_v10 = vadd.f32 %v1211_v34, %v466_v30  ;;  %v470_v12 = vadd.f32 %v1211_v34, %v469_v43  ;;  %v667_v14 = vmul.f32 %v1232_v49, %v488_v45 }
  0xf6   : > { %v679_v61 = vadd.f32 %v678_v55, %v664_v52  ;;  %v701_v63 = vmul.f32 %v664_v52, %v664_v52  ;;  %v715_v0 = vadd.f32 %v714_v51, %v700_v32  ;;  %v976_v3 = vpack.c.bf16 %v486_v56, %v485_v41 }
  0xf7   : > { %1005 = vst [vmem:[%s1257_s9 + $0x18] sm:$0xff] %v981_v57   ;;  %v665_v48 = vmul.f32 %v1237_v53, %v486_v56  ;;  %v594_v47 = vadd.s32 120, %v1183_v13  ;;  %v493_v20 = vmax.f32 %v467_v10, 0.0  ;;  %v496_v22 = vmax.f32 %v478_v11, 0.0 }
  0xf8   : > { %v716_v9 = vadd.f32 %v715_v0, %v701_v63  ;;  %1004 = vst [vmem:[%s1257_s9 + $0x10] sm:$0xff] %v976_v3   ;;  %v494_v53 = vmax.f32 %v470_v12, 0.0  ;;  %v609_v6 = vadd.s32 %v1187_v15, %v592_v60  ;;  %v703_v21 = vmul.f32 %v666_v4, %v666_v4 }
  0xf9   : > { %v680_v16 = vadd.f32 %v679_v61, %v665_v48  ;;  %v702_v19 = vmul.f32 %v665_v48, %v665_v48  ;;  %vm624_vm14 = vcmp.lt.s32.totalorder %v608_v59, 512  ;;  %v705_v25 = vmul.f32 %v668_v5, %v668_v5 }
  0xfa   : > { %v610_v34 = vadd.s32 %v1187_v15, %v593_v58  ;;  %v1001_v26 = vpack.c.bf16 %v496_v22, %v495_v8  ;;  %v996_v49 = vpack.c.bf16 %v494_v53, %v493_v20  ;;  %v704_v27 = vmul.f32 %v667_v14, %v667_v14 }
  0xfb   : > { %v681_v23 = vadd.f32 %v680_v16, %v666_v4  ;;  %v717_v24 = vadd.f32 %v716_v9, %v702_v19  ;;  %v669_v13 = vmul.f32 %v1270_v18, %v490_v37  ;;  %v941_v30 = vsel %vm624_vm14, 1.0, %v1111_v36 }
  0xfc   : > { %1009 = vst [vmem:[%s1257_s9 + $0x38] sm:$0xff] %v1001_v26   ;;  %v611_v31 = vadd.s32 %v1187_v15, %v594_v47  ;;  %1008 = vst [vmem:[%s1257_s9 + $0x30] sm:$0xff] %v996_v49   ;;  %v670_v32 = vmul.f32 %v1249_v2, %v491_v1  ;;  %vm625_vm15 = vcmp.lt.s32.totalorder %v609_v6, 512  ;;  %v671_v38 = vmul.f32 %v1266_v17, %v492_v7 }
  0xfd   : > { %v718_v28 = vadd.f32 %v717_v24, %v703_v21  ;;  %v682_v29 = vadd.f32 %v681_v23, %v667_v14  ;;  %vm626_vm0 = vcmp.lt.s32.totalorder %v610_v34, 512  ;;  %v706_v37 = vmul.f32 %v669_v13, %v669_v13 }
  0xfe   : > { %v672_v40 = vmul.f32 %v941_v30, %v493_v20  ;;  %v942_v41 = vsel %vm625_vm15, 1.0, %v1111_v36  ;;  %v707_v15 = vmul.f32 %v670_v32, %v670_v32  ;;  %vm627_vm1 = vcmp.lt.s32.totalorder %v611_v31, 512 }
  0xff   : > { %v683_v33 = vadd.f32 %v682_v29, %v668_v5  ;;  %v719_v35 = vadd.f32 %v718_v28, %v704_v27  ;;  %v708_v54 = vmul.f32 %v671_v38, %v671_v38  ;;  %v943_v1 = vsel %vm626_vm0, 1.0, %v1111_v36 }
 0x100   : > { %v709_v45 = vmul.f32 %v672_v40, %v672_v40  ;;  %v673_v62 = vmul.f32 %v942_v41, %v494_v53  ;;  %v944_v7 = vsel %vm627_vm1, 1.0, %v1111_v36  ;;  %v674_v17 = vmul.f32 %v943_v1, %v495_v8 }
 0x101   : > { %v720_v39 = vadd.f32 %v719_v35, %v705_v25  ;;  %v684_v18 = vadd.f32 %v683_v33, %v669_v13  ;;  %v675_v52 = vmul.f32 %v944_v7, %v496_v22 }
 0x102   : > { %v710_v56 = vmul.f32 %v673_v62, %v673_v62  ;;  %v711_v57 = vmul.f32 %v674_v17, %v674_v17 }
 0x103   : > { %v685_v42 = vadd.f32 %v684_v18, %v670_v32  ;;  %v721_v43 = vadd.f32 %v720_v39, %v706_v37  ;;  %v712_v60 = vmul.f32 %v675_v52, %v675_v52 }
 0x105   : > { %v722_v2 = vadd.f32 %v721_v43, %v707_v15  ;;  %v686_v44 = vadd.f32 %v685_v42, %v671_v38 }
 0x107   : > { %v687_v46 = vadd.f32 %v686_v44, %v672_v40  ;;  %v723_v50 = vadd.f32 %v722_v2, %v708_v54 }
 0x109   : > { %v724_v51 = vadd.f32 %v723_v50, %v709_v45  ;;  %v688_v55 = vadd.f32 %v687_v46, %v673_v62 }
 0x10b   : > { %v689_v58 = vadd.f32 %v688_v55, %v674_v17  ;;  %v725_v59 = vadd.f32 %v724_v51, %v710_v56 }
 0x10d   : > { %v690_v61 = vadd.f32 %v689_v58, %v675_v52  ;;  %v726_v63 = vadd.f32 %v725_v59, %v711_v57 }
 0x10f   : > { %v691_v0 = vrot.slane %v690_v61, 4  ;;  %v727_v3 = vadd.f32 %v726_v63, %v712_v60 }
 0x111   : > { %v692_v4 = vadd.f32 %v691_v0, %v690_v61  ;;  %v728_v36 = vrot.slane %v727_v3, 4 }
 0x113   : > { %v693_v48 = vrot.slane %v692_v4, 2  ;;  %v729_v5 = vadd.f32 %v728_v36, %v727_v3 }
 0x115   : > { %v694_v8 = vadd.f32 %v693_v48, %v692_v4  ;;  %v730_v9 = vrot.slane %v729_v5, 2 }
 0x117   : > { %v695_v10 = vrot.slane %v694_v8, 1  ;;  %v731_v11 = vadd.f32 %v730_v9, %v729_v5 }
 0x119   : > { %v732_v12 = vrot.slane %v731_v11, 1  ;;  %v696_v14 = vadd.f32 %v695_v10, %v694_v8 }
 0x11b   : > { %v733_v16 = vadd.f32 %v732_v12, %v731_v11 }
 0x11d   : > { %v735_v19 = vsel %vm734_vm2, %v696_v14, %v733_v16 }
 0x11e   : > { %736 = vst [vmem:[%s270_s13] sm:$0x3] %v735_v19 }
 0x11f PF: > { %s15_s17 = sadd.s32 1, %s1109_s17   ;;  %s1338_s15 = smov %s1105_s16 }
 0x120   : > { %p12_p6 = scmp.ge.s32.totalorder %s15_s17, 6   ;;  %s1339_s16 = smov %s1341_s18 }
 0x122   :  { %14 = sbr.rel (!%p12_p6) target bundleno = 2 (0x2), region = 80 }

// kernel: unet_conv_block.7
= control target key start
LH: loop header
LB: loop body
LE: loop exit
PB: predicated region body
PF: predicated region fallthrough
CT: control target
= control target key end

     0   :  { %s551_s12 = smov 0   ;;  %s553_s13 = smov 0   ;;  %s618_s0 = inlined_call_operand.vmem [shape: bf16[512,128], index: 0, kind: input, shape index: {}]   ;;  %s619_s1 = inlined_call_operand.vmem [shape: f32[1,128], index: 1, kind: input, shape index: {}]   ;;  %s620_s2 = inlined_call_operand.vmem [shape: f32[1,128], index: 2, kind: input, shape index: {}]   ;;  %s621_s3 = inlined_call_operand.vmem [shape: f32[512,128], index: 3, kind: output, shape index: {}]  }
   0x1   :  { %s555_s14 = smov 0  }
   0x2 LB: > { %s25_s15 = sadd.s32 1, %s525_s13  ;;  %p435_p0 = scmp.ge.s32.totalorder %s529_s14, 1  ;;  %s529_s14 = sphi %s555_s14, %s13_s14   ;;  %s525_s13 = sphi %s553_s13, %s623_s13   ;;  %s521_s12 = sphi %s551_s12, %s622_s12  }
   0x3   : > { %p27_p1 = scmp.ge.s32.totalorder %s25_s15, 4  ;;  %p173_p2 = scmp.lt.s32.totalorder %s529_s14, 5 }
   0x5   : > { %s625_s15 = smov (%p27_p1, %s25_s15), 0  ;;  %p174_p3 = pnand %p435_p0, %p173_p2 }
   0x6   : > { %s436_s16 = sshll.u32 (!%p174_p3), %s521_s12, 4  ;;  %v440_v0 = vld [vmem:[%s619_s1] ss:$0 sm:$0xff] (!%p174_p3) }
   0x7   : > { %177 = sbr.rel (%p174_p3) target bundleno = 34 (0x22), region = 32  ;;  %p210_p4 = scmp.lt.s32.totalorder (!%p174_p3), %s436_s16, 63  ;;  %v441_v9 = vld [vmem:[%s620_s2] ss:$0 sm:$0xff] (!%p174_p3) }
   0xe   : > { %s627_s16 = smov (!%p210_p4, %s436_s16), 63 }
   0xf   : > { %s437_s17 = sshll.u32 %s627_s16, 2  ;;  %s439_s23 = sshll.u32 %s627_s16, 3 }
  0x10   : > { %s572_s20 = scalar_lea.vmem %s618_s0, %s437_s17  ;;  %s587_s28 = scalar_lea.vmem %s621_s3, %s439_s23 }
  0x11   : > { %v445_v1 = vld [vmem:[%s572_s20] sm:$0xff]   ;;  %v476_v2 = vld [vmem:[%s572_s20 + $0x8] sm:$0xff]   ;;  %v477_v3 = vld [vmem:[%s572_s20 + $0x10] sm:$0xff]  }
  0x12   : > { %v446_v4 = vunpack.c.l.bf16 %v445_v1  ;;  %v447_v5 = vunpack.c.h.bf16 %v445_v1  ;;  %v450_v6 = vunpack.c.l.bf16 %v476_v2  ;;  %v451_v7 = vunpack.c.h.bf16 %v476_v2  ;;  %v478_v8 = vld [vmem:[%s572_s20 + $0x18] sm:$0xff]   ;;  %v479_v22 = vld [vmem:[%s572_s20 + $0x20] sm:$0xff]   ;;  %v480_v23 = vld [vmem:[%s572_s20 + $0x28] sm:$0xff]  }
  0x13   : > { %v454_v10 = vunpack.c.l.bf16 %v477_v3  ;;  %v455_v11 = vunpack.c.h.bf16 %v477_v3  ;;  %v458_v12 = vunpack.c.l.bf16 %v478_v8  ;;  %v459_v13 = vunpack.c.h.bf16 %v478_v8  ;;  %v481_v28 = vld [vmem:[%s572_s20 + $0x30] sm:$0xff]   ;;  %v482_v29 = vld [vmem:[%s572_s20 + $0x38] sm:$0xff]  }
  0x14   : > { %v272_v14 = vmul.f32 %v446_v4, %v440_v0  ;;  %v273_v15 = vmul.f32 %v447_v5, %v440_v0  ;;  %v274_v16 = vmul.f32 %v450_v6, %v440_v0  ;;  %v275_v17 = vmul.f32 %v451_v7, %v440_v0 }
  0x15   : > { %v276_v18 = vmul.f32 %v454_v10, %v440_v0  ;;  %v277_v19 = vmul.f32 %v455_v11, %v440_v0  ;;  %v278_v20 = vmul.f32 %v458_v12, %v440_v0  ;;  %v279_v21 = vmul.f32 %v459_v13, %v440_v0 }
  0x16   : > { %v295_v24 = vadd.f32 %v441_v9, %v272_v14  ;;  %v296_v25 = vadd.f32 %v441_v9, %v273_v15  ;;  %v297_v26 = vadd.f32 %v441_v9, %v274_v16  ;;  %v298_v27 = vadd.f32 %v441_v9, %v275_v17 }
  0x17   : > { %v299_v30 = vadd.f32 %v441_v9, %v276_v18  ;;  %v300_v31 = vadd.f32 %v441_v9, %v277_v19  ;;  %v301_v32 = vadd.f32 %v441_v9, %v278_v20  ;;  %v302_v33 = vadd.f32 %v441_v9, %v279_v21 }
  0x18   : > { %311 = vst [vmem:[%s587_s28] sm:$0xff] %v295_v24  ;;  %312 = vst [vmem:[%s587_s28 + $0x8] sm:$0xff] %v296_v25  ;;  %v462_v34 = vunpack.c.l.bf16 %v479_v22  ;;  %v463_v35 = vunpack.c.h.bf16 %v479_v22  ;;  %v466_v36 = vunpack.c.l.bf16 %v480_v23  ;;  %v467_v37 = vunpack.c.h.bf16 %v480_v23 }
  0x19   : > { %313 = vst [vmem:[%s587_s28 + $0x10] sm:$0xff] %v297_v26  ;;  %314 = vst [vmem:[%s587_s28 + $0x18] sm:$0xff] %v298_v27  ;;  %v470_v38 = vunpack.c.l.bf16 %v481_v28  ;;  %v471_v39 = vunpack.c.h.bf16 %v481_v28  ;;  %v474_v40 = vunpack.c.l.bf16 %v482_v29  ;;  %v475_v41 = vunpack.c.h.bf16 %v482_v29 }
  0x1a   : > { %315 = vst [vmem:[%s587_s28 + $0x20] sm:$0xff] %v299_v30  ;;  %316 = vst [vmem:[%s587_s28 + $0x28] sm:$0xff] %v300_v31  ;;  %v280_v42 = vmul.f32 %v462_v34, %v440_v0  ;;  %v281_v43 = vmul.f32 %v463_v35, %v440_v0  ;;  %v282_v44 = vmul.f32 %v466_v36, %v440_v0 }
  0x1b   : > { %317 = vst [vmem:[%s587_s28 + $0x30] sm:$0xff] %v301_v32  ;;  %318 = vst [vmem:[%s587_s28 + $0x38] sm:$0xff] %v302_v33  ;;  %v283_v45 = vmul.f32 %v467_v37, %v440_v0  ;;  %v284_v46 = vmul.f32 %v470_v38, %v440_v0  ;;  %v285_v47 = vmul.f32 %v471_v39, %v440_v0 }
  0x1c   : > { %v286_v48 = vmul.f32 %v474_v40, %v440_v0  ;;  %v287_v49 = vmul.f32 %v475_v41, %v440_v0  ;;  %v303_v50 = vadd.f32 %v441_v9, %v280_v42  ;;  %v304_v51 = vadd.f32 %v441_v9, %v281_v43 }
  0x1d   : > { %v305_v52 = vadd.f32 %v441_v9, %v282_v44  ;;  %v306_v53 = vadd.f32 %v441_v9, %v283_v45  ;;  %v307_v54 = vadd.f32 %v441_v9, %v284_v46  ;;  %v308_v55 = vadd.f32 %v441_v9, %v285_v47 }
  0x1e   : > { %v309_v56 = vadd.f32 %v441_v9, %v286_v48  ;;  %v310_v57 = vadd.f32 %v441_v9, %v287_v49  ;;  %319 = vst [vmem:[%s587_s28 + $0x40] sm:$0xff] %v303_v50  ;;  %320 = vst [vmem:[%s587_s28 + $0x48] sm:$0xff] %v304_v51 }
  0x1f   : > { %321 = vst [vmem:[%s587_s28 + $0x50] sm:$0xff] %v305_v52  ;;  %322 = vst [vmem:[%s587_s28 + $0x58] sm:$0xff] %v306_v53 }
  0x20   : > { %323 = vst [vmem:[%s587_s28 + $0x60] sm:$0xff] %v307_v54  ;;  %324 = vst [vmem:[%s587_s28 + $0x68] sm:$0xff] %v308_v55 }
  0x21   : > { %325 = vst [vmem:[%s587_s28 + $0x70] sm:$0xff] %v309_v56  ;;  %326 = vst [vmem:[%s587_s28 + $0x78] sm:$0xff] %v310_v57 }
  0x22 PF: > { %s13_s14 = sadd.s32 1, %s529_s14   ;;  %s622_s12 = smov %s525_s13 }
  0x23   : > { %p10_p5 = scmp.ge.s32.totalorder %s13_s14, 6   ;;  %s623_s13 = smov %s625_s15 }
  0x25   :  { %12 = sbr.rel (!%p10_p5) target bundleno = 2 (0x2), region = 68 }

// kernel: unet_conv_block.6
= control target key start
LH: loop header
LB: loop body
LE: loop exit
PB: predicated region body
PF: predicated region fallthrough
CT: control target
= control target key end

     0   :  { %s1167_s15 = smov 0   ;;  %s1169_s16 = smov 0   ;;  %s1371_s0 = inlined_call_operand.vmem [shape: bf16[512,72], index: 0, kind: input, shape index: {}]   ;;  %s1372_s1 = inlined_call_operand.vmem [shape: bf16[72,128], index: 1, kind: input, shape index: {}]   ;;  %s1373_s2 = inlined_call_operand.vmem [shape: f32[1,128], index: 2, kind: input, shape index: {}]   ;;  %s1374_s3 = inlined_call_operand.vmem [shape: bf16[512,128], index: 3, kind: output, shape index: {0}]   ;;  %s1375_s4 = inlined_call_operand.vmem [shape: f32[4,2,128], index: 4, kind: output, shape index: {1}]  }
   0x1   :  { %s1171_s17 = smov 0  }
   0x2 LB: > { %s27_s18 = sadd.s32 1, %s1135_s16  ;;  %p902_p0 = scmp.ge.s32.totalorder %s1139_s17, 1  ;;  %s1139_s17 = sphi %s1171_s17, %s15_s17   ;;  %s1135_s16 = sphi %s1169_s16, %s1377_s16   ;;  %s1131_s15 = sphi %s1167_s15, %s1376_s15  }
   0x3   : > { %p29_p1 = scmp.ge.s32.totalorder %s27_s18, 4  ;;  %p199_p2 = scmp.lt.s32.totalorder %s1139_s17, 5 }
   0x5   : > { %s1379_s18 = smov (%p29_p1, %s27_s18), 0  ;;  %p200_p3 = pnand %p902_p0, %p199_p2 }
   0x6   : > { %v1104_v0 = vld [vmem:[%s1372_s1] sm:$0xff] (!%p200_p3)   ;;  %v1105_v1 = vld [vmem:[%s1372_s1 + $0x8] sm:$0xff] (!%p200_p3)   ;;  %s903_s23 = sshll.u32 (!%p200_p3), %s1131_s15, 4  ;;  %v1106_v2 = vld [vmem:[%s1372_s1 + $0x10] sm:$0xff] (!%p200_p3)   ;;  %vm371_vm0 = vcmask (!%p200_p3), 588800   ;;  %vm396_vm1 = vcmask (!%p200_p3), 1043456   ;;  %v594_v14 = vlaneseq (!%p200_p3) }
   0x7   : > { %203 = sbr.rel (%p200_p3) target bundleno = 295 (0x127), region = 32  ;;  %1041 = vmatprep.subr.bf16.mxu0 (!%p200_p3), %v1104_v0  ;;  %1067 = vmatprep.subr.bf16.mxu1 (!%p200_p3), %v1104_v0  ;;  %p243_p4 = scmp.lt.s32.totalorder (!%p200_p3), %s903_s23, 63  ;;  %v1107_v3 = vld [vmem:[%s1372_s1 + $0x18] sm:$0xff] (!%p200_p3)   ;;  %v1108_v5 = vld [vmem:[%s1372_s1 + $0x20] ss:$0 sps:$4 sm:$0xff] (!%p200_p3)   ;;  %v1141_v36 = vmov (!%p200_p3), 0.0  }
   0x8   : > { %1042 = vmatpush3.bf16.msra.mxu0 (!%p200_p3), %v1104_v0  ;;  %1072 = vmatpush3.bf16.msra.mxu1 (!%p200_p3), %v1104_v0  ;;  %v398_v7 = vsel (!%p200_p3), %vm396_vm1, %v1108_v5, 0  ;;  %v1219_v15 = vshrl.u32 (!%p200_p3), %v594_v14, 7  ;;  %s946_s8 = sshll.u32 (!%p200_p3), %s1131_s15, 7  ;;  %v1246_v35 = vld [vmem:[%s1373_s2] ss:$0 sm:$0xff] (!%p200_p3)  ;;  %p264_p5 = scmp.lt.s32.totalorder (!%p200_p3), %s1131_s15, 3 }
   0x9   : > { %1043 = vmatprep.subr.bf16.mxu0 (!%p200_p3), %v1105_v1  ;;  %1068 = vmatprep.subr.bf16.mxu1 (!%p200_p3), %v1105_v1  ;;  %v1223_v17 = vstv (!%p200_p3), %s946_s8 }
   0xa   : > { %v597_v16 = vadd.s32 (!%p200_p3), 16, %v1219_v15  ;;  %v598_v18 = vadd.s32 (!%p200_p3), 24, %v1219_v15  ;;  %v596_v19 = vadd.s32 (!%p200_p3), 8, %v1219_v15  ;;  %v601_v20 = vadd.s32 (!%p200_p3), 48, %v1219_v15 }
   0xb   : > { %v599_v21 = vadd.s32 (!%p200_p3), 32, %v1219_v15  ;;  %v602_v22 = vadd.s32 (!%p200_p3), 56, %v1219_v15  ;;  %v600_v24 = vadd.s32 (!%p200_p3), 40, %v1219_v15  ;;  %v612_v25 = vadd.s32 (!%p200_p3), %v1223_v17, %v1219_v15 }
   0xc   : > { %1044 = vmatpush3.bf16.msra.mxu0 (!%p200_p3), %v1105_v1  ;;  %1073 = vmatpush3.bf16.msra.mxu1 (!%p200_p3), %v1105_v1  ;;  %v614_v23 = vadd.s32 (!%p200_p3), %v1223_v17, %v597_v16  ;;  %v615_v26 = vadd.s32 (!%p200_p3), %v1223_v17, %v598_v18  ;;  %v613_v27 = vadd.s32 (!%p200_p3), %v1223_v17, %v596_v19  ;;  %v605_v32 = vadd.s32 (!%p200_p3), 80, %v1219_v15 }
   0xd   : > { %1045 = vmatprep.subr.bf16.mxu0 (!%p200_p3), %v1106_v2  ;;  %1069 = vmatprep.subr.bf16.mxu1 (!%p200_p3), %v1106_v2  ;;  %v618_v28 = vadd.s32 (!%p200_p3), %v1223_v17, %v601_v20  ;;  %v616_v29 = vadd.s32 (!%p200_p3), %v1223_v17, %v599_v21  ;;  %v619_v30 = vadd.s32 (!%p200_p3), %v1223_v17, %v602_v22  ;;  %vm628_vm3 = vcmp.lt.s32.totalorder (!%p200_p3), %v612_v25, 512 }
   0xe   : > { %s1381_s23 = smov (!%p243_p4, %s903_s23), 63  ;;  %vm630_vm2 = vcmp.lt.s32.totalorder %v614_v23, 512  ;;  %v617_v31 = vadd.s32 %v1223_v17, %v600_v24  ;;  %vm631_vm4 = vcmp.lt.s32.totalorder %v615_v26, 512  ;;  %v603_v33 = vadd.s32 64, %v1219_v15  ;;  %s1383_s15 = smov (!%p264_p5, %s1131_s15), 3 }
   0xf   : > { %s904_s26 = sshll.u32 %s1381_s23, 2  ;;  %vm629_vm5 = vcmp.lt.s32.totalorder %v613_v27, 512  ;;  %vm634_vm6 = vcmp.lt.s32.totalorder %v618_v28, 512  ;;  %vm632_vm7 = vcmp.lt.s32.totalorder %v616_v29, 512  ;;  %v606_v34 = vadd.s32 88, %v1219_v15  ;;  %s907_s14 = sshll.u32 %s1383_s15, 1 }
  0x10   : > { %s246_s5 = scalar_lea.vmem %s1371_s0, %s904_s26  ;;  %1046 = vmatpush3.bf16.msra.mxu0 %v1106_v2  ;;  %1074 = vmatpush3.bf16.msra.mxu1 %v1106_v2  ;;  %v949_v37 = vsel %vm630_vm2, 1.0, %v1141_v36  ;;  %vm635_vm8 = vcmp.lt.s32.totalorder %v619_v30, 512  ;;  %v604_v38 = vadd.s32 72, %v1219_v15  ;;  %v947_v39 = vsel %vm628_vm3, 1.0, %v1141_v36  ;;  %s1293_s13 = scalar_lea.vmem %s1374_s3, %s904_s26 }
  0x11   : > { %v1109_v4 = vld [vmem:[%s246_s5] sm:$0xff]   ;;  %1047 = vmatprep.subr.bf16.mxu0 %v1107_v3  ;;  %1070 = vmatprep.subr.bf16.mxu1 %v1107_v3  ;;  %v1110_v8 = vld [vmem:[%s246_s5 + $0x8] sm:$0xff]   ;;  %v1111_v10 = vld [vmem:[%s246_s5 + $0x10] sm:$0xff]   ;;  %v950_v40 = vsel %vm631_vm4, 1.0, %v1141_v36  ;;  %vm633_vm9 = vcmp.lt.s32.totalorder %v617_v31, 512  ;;  %v622_v41 = vadd.s32 %v1223_v17, %v605_v32  ;;  %v948_v43 = vsel %vm629_vm5, 1.0, %v1141_v36  ;;  %s270_s21 = scalar_lea.vmem %s1375_s4, %s907_s14 }
  0x12   : > { %1051 = vmatprep.mubr.msk.bf16.mxu0 %vm371_vm0, %v1109_v4  ;;  %v1113_v6 = vld [vmem:[%s246_s5 + $0x20] sm:$0xff]   ;;  %v1114_v9 = vld [vmem:[%s246_s5 + $0x28] sm:$0xff]   ;;  %v1115_v11 = vld [vmem:[%s246_s5 + $0x30] sm:$0xff]   ;;  %v1255_v44 = vsel %vm634_vm6, 1.0, %v1141_v36  ;;  %v1258_v45 = vsel %vm632_vm7, 1.0, %v1141_v36  ;;  %v620_v47 = vadd.s32 %v1223_v17, %v603_v33  ;;  %v1263_v50 = vsel %vm635_vm8, 1.0, %v1141_v36 }
  0x13   : > { %1059 = vmatprep.mubr.msk.bf16.mxu1 %vm371_vm0, %v1113_v6  ;;  %v1112_v12 = vld [vmem:[%s246_s5 + $0x18] sm:$0xff]   ;;  %v623_v53 = vadd.s32 %v1223_v17, %v606_v34  ;;  %v1272_v56 = vsel %vm633_vm9, 1.0, %v1141_v36  ;;  %v621_v59 = vadd.s32 %v1223_v17, %v604_v38  ;;  %vm638_vm10 = vcmp.lt.s32.totalorder %v622_v41, 512 }
  0x14   : > { %1048 = vmatpush3.bf16.msra.mxu0 %v1107_v3  ;;  %1075 = vmatpush3.bf16.msra.mxu1 %v1107_v3  ;;  %v1116_v13 = vld [vmem:[%s246_s5 + $0x38] sm:$0xff]   ;;  %vm636_vm11 = vcmp.lt.s32.totalorder %v620_v47, 512  ;;  %vm750_vm2 = vcmask 1040384  }
  0x15   : > { %1077 = vmatprep.subr.msk.bf16.mxu0 %vm396_vm1, %v1108_v5  ;;  %1078 = vmatprep.subr.msk.bf16.mxu1 %vm396_vm1, %v1108_v5  ;;  %vm639_vm12 = vcmp.lt.s32.totalorder %v623_v53, 512  ;;  %vm637_vm13 = vcmp.lt.s32.totalorder %v621_v59, 512  ;;  %v955_v19 = vsel %vm636_vm11, 1.0, %v1141_v36 }
  0x16   : > { %v1304_v20 = vsel %vm639_vm12, 1.0, %v1141_v36 }
  0x18   : > { %1050 = vmatpush3.bf16.msra.mxu0 %v398_v7  ;;  %1076 = vmatpush3.bf16.msra.mxu1 %v398_v7 }
  0x1b   : > { %1052 = vmatmul.mubr.msk.bf16.vlgmr.msra.gmra.mrb[0].mxu0 %vm371_vm0, %v1110_v8  ;;  %1060 = vmatmul.mubr.msk.bf16.vlgmr.msra.gmra.mrb[0].mxu1 %vm371_vm0, %v1114_v9 }
  0x1c   : > { %1055 = vmatprep.mubr.msk.bf16.mxu0 %vm371_vm0, %v1111_v10  ;;  %1063 = vmatprep.mubr.msk.bf16.mxu1 %vm371_vm0, %v1115_v11 }
  0x23   : > { %1056 = vmatmul.mubr.msk.bf16.gmra.mrb[4].mxu0 %vm371_vm0, %v1112_v12  ;;  %1064 = vmatmul.mubr.msk.bf16.gmra.mrb[4].mxu1 %vm371_vm0, %v1116_v13  ;;  %v1299_v13 = vsel %vm638_vm10, 1.0, %v1141_v36 }
  0xee   : > { %v1053_v42 = vpop.f32.mrb[0].mxu0  ;;  %v1061_v46 = vpop.f32.mrb[0].mxu1 }
  0xef   : > { %v443_v48 = vadd.f32 %v1053_v42, %v1246_v35  ;;  %v434_v49 = vpop.f32.mrb[1].mxu0  ;;  %v1266_v51 = vadd.f32 %v1061_v46, %v1246_v35  ;;  %v466_v52 = vpop.f32.mrb[1].mxu1 }
  0xf0   : > { %v435_v54 = vadd.f32 %v1246_v35, %v434_v49  ;;  %v1054_v55 = vpop.f32.mrb[2].mxu0  ;;  %v1275_v57 = vadd.f32 %v1246_v35, %v466_v52  ;;  %v1062_v58 = vpop.f32.mrb[2].mxu1 }
  0xf1   : > { %v499_v60 = vmax.f32 %v443_v48, 0.0  ;;  %v446_v61 = vadd.f32 %v1054_v55, %v1246_v35  ;;  %v437_v62 = vpop.f32.mrb[3].mxu0  ;;  %v1280_v63 = vadd.f32 %v1062_v58, %v1246_v35  ;;  %v469_v0 = vpop.f32.mrb[3].mxu1  ;;  %v507_v5 = vmax.f32 %v1266_v51, 0.0 }
  0xf2   : > { %v497_v1 = vmax.f32 %v435_v54, 0.0  ;;  %v438_v2 = vadd.f32 %v1246_v35, %v437_v62  ;;  %v1284_v3 = vadd.f32 %v1246_v35, %v469_v0  ;;  %v505_v9 = vmax.f32 %v1275_v57, 0.0 }
  0xf3   : > { %v500_v4 = vmax.f32 %v446_v61, 0.0  ;;  %v508_v6 = vmax.f32 %v1280_v63, 0.0  ;;  %v678_v11 = vmul.f32 %v949_v37, %v499_v60  ;;  %v608_v62 = vadd.s32 104, %v1219_v15 }
  0xf4   : > { %v676_v7 = vmul.f32 %v947_v39, %v497_v1  ;;  %v498_v8 = vmax.f32 %v438_v2, 0.0  ;;  %v506_v10 = vmax.f32 %v1284_v3, 0.0  ;;  %v956_v39 = vsel %vm637_vm13, 1.0, %v1141_v36 }
  0xf5   : > { %v989_v12 = vpack.c.bf16 %v500_v4, %v499_v60  ;;  %v679_v23 = vmul.f32 %v950_v40, %v500_v4  ;;  %v1009_v26 = vpack.c.bf16 %v508_v6, %v507_v5  ;;  %v715_v34 = vmul.f32 %v678_v11, %v678_v11 }
  0xf6   : > { %v984_v14 = vpack.c.bf16 %v498_v8, %v497_v1  ;;  %v677_v16 = vmul.f32 %v948_v43, %v498_v8  ;;  %v1057_v18 = vpop.f32.mrb[4].mxu0  ;;  %v1065_v21 = vpop.f32.mrb[4].mxu1  ;;  %v713_v22 = vmul.f32 %v676_v7, %v676_v7  ;;  %v1004_v32 = vpack.c.bf16 %v506_v10, %v505_v9 }
  0xf7   : > { %1021 = vst [vmem:[%s1293_s13 + $0x8] sm:$0xff] %v989_v12   ;;  %v459_v24 = vadd.f32 %v1057_v18, %v1246_v35  ;;  %v450_v25 = vpop.f32.mrb[5].mxu0  ;;  %v482_v27 = vpop.f32.mrb[5].mxu1  ;;  %1025 = vst [vmem:[%s1293_s13 + $0x28] sm:$0xff] %v1009_v26   ;;  %v607_v40 = vadd.s32 96, %v1219_v15  ;;  %v716_v48 = vmul.f32 %v679_v23, %v679_v23  ;;  %v1324_v53 = vadd.f32 %v1065_v21, %v1246_v35 }
  0xf8   : > { %985 = vst [vmem:[%s1293_s13] sm:$0xff] %v984_v14   ;;  %v692_v28 = vadd.f32 %v677_v16, %v676_v7  ;;  %v714_v29 = vmul.f32 %v677_v16, %v677_v16  ;;  %v451_v30 = vadd.f32 %v1246_v35, %v450_v25  ;;  %v1058_v31 = vpop.f32.mrb[6].mxu0  ;;  %v1066_v33 = vpop.f32.mrb[6].mxu1  ;;  %1024 = vst [vmem:[%s1293_s13 + $0x20] sm:$0xff] %v1004_v32   ;;  %v609_v60 = vadd.s32 112, %v1219_v15 }
  0xf9   : > { %v462_v37 = vadd.f32 %v1058_v31, %v1246_v35  ;;  %v453_v38 = vpop.f32.mrb[7].mxu0  ;;  %v485_v41 = vpop.f32.mrb[7].mxu1  ;;  %v503_v49 = vmax.f32 %v459_v24, 0.0  ;;  %v624_v61 = vadd.s32 %v1223_v17, %v607_v40  ;;  %v511_v14 = vmax.f32 %v1324_v53, 0.0 }
  0xfa   : > { %v693_v42 = vadd.f32 %v692_v28, %v678_v11  ;;  %v729_v43 = vadd.f32 %v714_v29, %v713_v22  ;;  %v501_v46 = vmax.f32 %v451_v30, 0.0  ;;  %v454_v47 = vadd.f32 %v1246_v35, %v453_v38 }
  0xfb   : > { %v504_v52 = vmax.f32 %v462_v37, 0.0  ;;  %v682_v7 = vmul.f32 %v1255_v44, %v503_v49  ;;  %v483_v11 = vadd.f32 %v1246_v35, %v482_v27  ;;  %v494_v16 = vadd.f32 %v1066_v33, %v1246_v35 }
  0xfc   : > { %v730_v54 = vadd.f32 %v729_v43, %v715_v34  ;;  %v680_v55 = vmul.f32 %v1258_v45, %v501_v46  ;;  %v694_v57 = vadd.f32 %v693_v42, %v679_v23  ;;  %v502_v58 = vmax.f32 %v454_v47, 0.0 }
  0xfd   : > { %v999_v59 = vpack.c.bf16 %v504_v52, %v503_v49  ;;  %v684_v45 = vmul.f32 %v955_v19, %v505_v9  ;;  %v486_v18 = vadd.f32 %v1246_v35, %v485_v41  ;;  %v683_v21 = vmul.f32 %v1263_v50, %v504_v52 }
  0xfe   : > { %v695_v0 = vadd.f32 %v694_v57, %v680_v55  ;;  %v717_v1 = vmul.f32 %v680_v55, %v680_v55  ;;  %v731_v2 = vadd.f32 %v730_v54, %v716_v48  ;;  %v994_v4 = vpack.c.bf16 %v502_v58, %v501_v46 }
  0xff   : > { %1023 = vst [vmem:[%s1293_s13 + $0x18] sm:$0xff] %v999_v59   ;;  %v681_v8 = vmul.f32 %v1272_v56, %v502_v58  ;;  %v509_v24 = vmax.f32 %v483_v11, 0.0  ;;  %v512_v44 = vmax.f32 %v494_v16, 0.0  ;;  %v610_v25 = vadd.s32 120, %v1219_v15 }
 0x100   : > { %v732_v12 = vadd.f32 %v731_v2, %v717_v1  ;;  %1022 = vst [vmem:[%s1293_s13 + $0x10] sm:$0xff] %v994_v4   ;;  %v510_v56 = vmax.f32 %v486_v18, 0.0  ;;  %v625_v9 = vadd.s32 %v1223_v17, %v608_v62  ;;  %v719_v19 = vmul.f32 %v682_v7, %v682_v7 }
 0x101   : > { %v696_v22 = vadd.f32 %v695_v0, %v681_v8  ;;  %v718_v23 = vmul.f32 %v681_v8, %v681_v8  ;;  %vm640_vm14 = vcmp.lt.s32.totalorder %v624_v61, 512  ;;  %v721_v28 = vmul.f32 %v684_v45, %v684_v45 }
 0x102   : > { %v626_v35 = vadd.s32 %v1223_v17, %v609_v60  ;;  %v1019_v29 = vpack.c.bf16 %v512_v44, %v511_v14  ;;  %v1014_v50 = vpack.c.bf16 %v510_v56, %v509_v24  ;;  %v720_v30 = vmul.f32 %v683_v21, %v683_v21 }
 0x103   : > { %v697_v26 = vadd.f32 %v696_v22, %v682_v7  ;;  %v733_v27 = vadd.f32 %v732_v12, %v718_v23  ;;  %v685_v15 = vmul.f32 %v956_v39, %v506_v10  ;;  %v959_v33 = vsel %vm640_vm14, 1.0, %v1141_v36 }
 0x104   : > { %1027 = vst [vmem:[%s1293_s13 + $0x38] sm:$0xff] %v1019_v29   ;;  %v627_v34 = vadd.s32 %v1223_v17, %v610_v25  ;;  %1026 = vst [vmem:[%s1293_s13 + $0x30] sm:$0xff] %v1014_v50   ;;  %v686_v37 = vmul.f32 %v1299_v13, %v507_v5  ;;  %vm641_vm15 = vcmp.lt.s32.totalorder %v625_v9, 512  ;;  %v687_v41 = vmul.f32 %v1304_v20, %v508_v6 }
 0x105   : > { %v734_v31 = vadd.f32 %v733_v27, %v719_v19  ;;  %v698_v32 = vadd.f32 %v697_v26, %v683_v21  ;;  %vm642_vm0 = vcmp.lt.s32.totalorder %v626_v35, 512  ;;  %v722_v39 = vmul.f32 %v685_v15, %v685_v15 }
 0x106   : > { %v688_v42 = vmul.f32 %v959_v33, %v509_v24  ;;  %v960_v43 = vsel %vm641_vm15, 1.0, %v1141_v36  ;;  %v723_v17 = vmul.f32 %v686_v37, %v686_v37  ;;  %vm643_vm1 = vcmp.lt.s32.totalorder %v627_v34, 512 }
 0x107   : > { %v699_v38 = vadd.f32 %v698_v32, %v684_v45  ;;  %v735_v40 = vadd.f32 %v734_v31, %v720_v30  ;;  %v724_v51 = vmul.f32 %v687_v41, %v687_v41  ;;  %v961_v5 = vsel %vm642_vm0, 1.0, %v1141_v36 }
 0x108   : > { %v725_v49 = vmul.f32 %v688_v42, %v688_v42  ;;  %v689_v63 = vmul.f32 %v960_v43, %v510_v56  ;;  %v962_v6 = vsel %vm643_vm1, 1.0, %v1141_v36  ;;  %v690_v20 = vmul.f32 %v961_v5, %v511_v14 }
 0x109   : > { %v736_v3 = vadd.f32 %v735_v40, %v721_v28  ;;  %v700_v10 = vadd.f32 %v699_v38, %v685_v15  ;;  %v691_v55 = vmul.f32 %v962_v6, %v512_v44 }
 0x10a   : > { %v726_v58 = vmul.f32 %v689_v63, %v689_v63  ;;  %v727_v59 = vmul.f32 %v690_v20, %v690_v20 }
 0x10b   : > { %v701_v46 = vadd.f32 %v700_v10, %v686_v37  ;;  %v737_v47 = vadd.f32 %v736_v3, %v722_v39  ;;  %v728_v62 = vmul.f32 %v691_v55, %v691_v55 }
 0x10d   : > { %v738_v13 = vadd.f32 %v737_v47, %v723_v17  ;;  %v702_v48 = vadd.f32 %v701_v46, %v687_v41 }
 0x10f   : > { %v703_v52 = vadd.f32 %v702_v48, %v688_v42  ;;  %v739_v53 = vadd.f32 %v738_v13, %v724_v51 }
 0x111   : > { %v740_v54 = vadd.f32 %v739_v53, %v725_v49  ;;  %v704_v57 = vadd.f32 %v703_v52, %v689_v63 }
 0x113   : > { %v705_v60 = vadd.f32 %v704_v57, %v690_v20  ;;  %v741_v61 = vadd.f32 %v740_v54, %v726_v58 }
 0x115   : > { %v706_v0 = vadd.f32 %v705_v60, %v691_v55  ;;  %v742_v1 = vadd.f32 %v741_v61, %v727_v59 }
 0x117   : > { %v707_v2 = vrot.slane %v706_v0, 4  ;;  %v743_v4 = vadd.f32 %v742_v1, %v728_v62 }
 0x119   : > { %v708_v7 = vadd.f32 %v707_v2, %v706_v0  ;;  %v744_v36 = vrot.slane %v743_v4, 4 }
 0x11b   : > { %v709_v8 = vrot.slane %v708_v7, 2  ;;  %v745_v45 = vadd.f32 %v744_v36, %v743_v4 }
 0x11d   : > { %v710_v11 = vadd.f32 %v709_v8, %v708_v7  ;;  %v746_v12 = vrot.slane %v745_v45, 2 }
 0x11f   : > { %v711_v14 = vrot.slane %v710_v11, 1  ;;  %v747_v16 = vadd.f32 %v746_v12, %v745_v45 }
 0x121   : > { %v748_v18 = vrot.slane %v747_v16, 1  ;;  %v712_v21 = vadd.f32 %v711_v14, %v710_v11 }
 0x123   : > { %v749_v22 = vadd.f32 %v748_v18, %v747_v16 }
 0x125   : > { %v751_v23 = vsel %vm750_vm2, %v712_v21, %v749_v22 }
 0x126   : > { %752 = vst [vmem:[%s270_s21] sm:$0x3] %v751_v23 }
 0x127 PF: > { %s15_s17 = sadd.s32 1, %s1139_s17   ;;  %s1376_s15 = smov %s1135_s16 }
 0x128   : > { %p12_p6 = scmp.ge.s32.totalorder %s15_s17, 6   ;;  %s1377_s16 = smov %s1379_s18 }
 0x12a   :  { %14 = sbr.rel (!%p12_p6) target bundleno = 2 (0x2), region = 80 }

</bundles_post_ra>
